<compile_context>
chip_gen: v6e
topology: v6e:2x2x1
jax: 0.10.0
libtpu: 0.0.40
codegen_flags: <defaults>
</compile_context>

<pallas_src>
import jax
import jax.numpy as jnp
import numpy as np
from jax.experimental import pallas as pl
from jax.experimental.pallas import tpu as pltpu


def _conv_taps(w_ref, base, K, off, src_ref, H, n_cols, n_acc=4):
    """sum_{a,b} w[a,b] * src[a+off : a+off+H, b+off : b+off+n_cols]  (cross-correlation).

    Uses several independent accumulators so the K*K adds do not form one serial VPU chain.
    """
    n_acc = min(n_acc, K * K)
    accs = [None] * n_acc
    t = 0
    for a in range(K):
        for b in range(K):
            w = w_ref[base + a * K + b]                              # scalar read from SMEM
            tap = w * src_ref[pl.ds(a + off, H), pl.ds(b + off, n_cols)]
            i = t % n_acc
            accs[i] = tap if accs[i] is None else accs[i] + tap
            t += 1
    out = accs[0]
    for acc in accs[1:]:
        out = out + acc
    return out


def _make_san2d_kernel(kernel_sizes, H, W, Nb, pmax):
    Wp = W + 2 * pmax          # per-image padded width inside the flat layout
    Nacc = Nb * Wp             # width of the flat accumulator (all images + per-image halos)
    bases = []
    s = 0
    for k in kernel_sizes:
        bases.append(s)
        s += k * k

    def kernel(w_ref, x_ref, out_ref, xpad_ref, act_ref):
        # Zero both padded scratches once per grid step: the halos MUST be zero ('same' conv).
        xpad_ref[...] = jnp.zeros_like(xpad_ref)
        act_ref[...] = jnp.zeros_like(act_ref)

        # Pack the Nb images of this block side by side along the lane axis, each inside its
        # own pmax halo: image n occupies flat columns [n*Wp, (n+1)*Wp).
        for n in range(Nb):
            xpad_ref[pl.ds(pmax, H), pl.ds(n * Wp + pmax, W)] = x_ref[n]

        # Flat column c = n*Wp + j is a real pixel iff (c mod Wp) < W; the rest are
        # inter-image halo positions whose conv results are garbage and must be dropped.
        col = jax.lax.broadcasted_iota(jnp.int32, (H, Nacc), 1)
        valid = (col % Wp) < W

        rec = jnp.zeros((H, Nacc), jnp.float32)
        for q, K in enumerate(kernel_sizes):
            off = pmax - (K - 1) // 2         # centre smaller kernels inside the pmax halo
            base = bases[q]
            # conv1: similarity = x (*) w_q ('same'), with the ReLU sparse activation fused.
            sim = _conv_taps(w_ref, base, K, off, xpad_ref, H, Nacc)
            act = jnp.where(valid, jnp.maximum(sim, 0.0), 0.0)
            act_ref[pl.ds(pmax, H), pl.ds(pmax, Nacc)] = act
            # conv2: reconstruction = act (*) w_q ('same'); accumulate in VMEM/vregs.
            rec = rec + _conv_taps(w_ref, base, K, off, act_ref, H, Nacc)

        # Write rec to HBM exactly once, dropping the inter-image halo columns.
        for n in range(Nb):
            out_ref[0, :, n * W:(n + 1) * W] = rec[:, n * Wp:n * Wp + W].astype(out_ref.dtype)

    return kernel


def _choose_batch_block(N, H, W, pmax, target_lanes=512, vmem_budget_bytes=8 * 1024 * 1024):
    """Pick how many images (Nb | N) to pack along the lane axis per grid step."""
    Wp = W + 2 * pmax
    Hp = H + 2 * pmax

    def scratch_bytes(nb):
        wf = nb * Wp + 2 * pmax
        # two padded f32 scratches + (double-buffered) input and output blocks
        return 4 * (2 * Hp * wf + 2 * 2 * nb * H * W)

    choice = 1
    for nb in range(1, N + 1):
        if N % nb:
            continue
        if scratch_bytes(nb) > vmem_budget_bytes:
            break
        choice = nb
        if nb * Wp >= target_lanes and N // nb >= 2:
            break
    return choice


def san2d_forward(x_nchw: jax.Array, kernel_weights: list[jax.Array]) -> jax.Array:
    """SAN2d forward. x_nchw: (N, 1, H, W) float32. Returns (N, 1, H, W)."""
    N, C, H, W = x_nchw.shape
    assert C == 1, "SAN2d conv weights are (1, 1, k, k) -> single channel"
    kernel_sizes = [int(w.shape[0]) for w in kernel_weights]
    for w, k in zip(kernel_weights, kernel_sizes):
        assert w.shape == (k, k) and k % 2 == 1, "odd kernels (symmetric 'same' padding)"

    pmax = (max(kernel_sizes) - 1) // 2
    Wp = W + 2 * pmax
    Hp = H + 2 * pmax

    Nb = _choose_batch_block(N, H, W, pmax)
    NB = N // Nb
    Nacc = Nb * Wp
    Wf = Nacc + 2 * pmax            # extra tail so every shifted tap slice stays in-bounds

    x = x_nchw[:, 0]                # (N, H, W)
    w_flat = jnp.concatenate([jnp.asarray(w, jnp.float32).reshape(-1) for w in kernel_weights])

    total_taps = sum(k * k for k in kernel_sizes)
    cost = pl.CostEstimate(
        flops=2 * 2 * total_taps * N * H * W,                 # two convs, MAC = 2 flops
        transcendentals=0,
        bytes_accessed=4 * (2 * N * H * W + int(w_flat.size)),
    )

    kern = _make_san2d_kernel(tuple(kernel_sizes), H, W, Nb, pmax)

    rec_flat = pl.pallas_call(
        kern,
        out_shape=jax.ShapeDtypeStruct((NB, H, Nb * W), x.dtype),
        grid=(NB,),
        in_specs=[
            pl.BlockSpec(memory_space=pltpu.MemorySpace.SMEM),    # flattened kernel weights
            pl.BlockSpec((Nb, H, W), lambda g: (g, 0, 0)),        # Nb images per grid step
        ],
        out_specs=pl.BlockSpec((1, H, Nb * W), lambda g: (g, 0, 0)),  # lane-dense output slab
        scratch_shapes=[
            pltpu.VMEM((Hp, Wf), jnp.float32),   # zero-padded input, flat-batch layout
            pltpu.VMEM((Hp, Wf), jnp.float32),   # zero-padded ReLU'd activation
        ],
        compiler_params=pltpu.CompilerParams(
            dimension_semantics=("parallel",),
            vmem_limit_bytes=32 * 1024 * 1024,   # explicit scoped limit; safe on v5e/v6e/v7x
        ),
        cost_estimate=cost,
    )(w_flat, x)

    # Layout plumbing only: (NB, H, Nb*W) flat slab -> (N, 1, H, W).
    rec = rec_flat.reshape(NB, H, Nb, W).transpose(0, 2, 1, 3).reshape(N, H, W)
    return rec[:, None, :, :]


def san2d_reference(x_nchw: jax.Array, kernel_weights: list[jax.Array]) -> jax.Array:
    """Pure-JAX reference mirroring the PyTorch forward (for correctness check)."""
    rec = jnp.zeros_like(x_nchw)
    dn = ("NCHW", "OIHW", "NCHW")
    for w in kernel_weights:
        wk = w[None, None]
        sim = jax.lax.conv_general_dilated(x_nchw, wk, (1, 1), "SAME", dimension_numbers=dn)
        act = jnp.maximum(sim, 0.0)
        rec = rec + jax.lax.conv_general_dilated(act, wk, (1, 1), "SAME", dimension_numbers=dn)
    return rec


if __name__ == "__main__":
    # Deterministic setup mirroring SAN2d.__init__:
    #   kernel_sizes = [3, 5]; weights = 0.1 * ones(k, k); sparse activations = ReLU.
    kernel_sizes = [3, 5]
    kernel_weights = [0.1 * jnp.ones((k, k), dtype=jnp.float32) for k in kernel_sizes]

    key = jax.random.PRNGKey(0)
    x = jax.random.normal(key, (2, 1, 16, 16), dtype=jnp.float32)  # NCHW, C=1

    out = san2d_forward(x, kernel_weights)
    out = jax.block_until_ready(out)

    ref = jax.block_until_ready(san2d_reference(x, kernel_weights))
    np.testing.assert_allclose(np.asarray(out), np.asarray(ref), rtol=1e-5, atol=1e-5)

    print("KERNEL_OK")
</pallas_src>

<mosaic_0001>
module attributes {stable_mosaic.version = 11 : i64} {
  func.func @kernel(%arg0: i32, %arg1: memref<34xf32, #tpu.memory_space<smem>>, %arg2: memref<2x16x16xf32, #tpu.memory_space<vmem>>, %arg3: memref<1x16x32xf32, #tpu.memory_space<vmem>>, %arg4: memref<20x44xf32, #tpu.memory_space<vmem>>, %arg5: memref<20x44xf32, #tpu.memory_space<vmem>>) attributes {dimension_semantics = [#tpu.dimension_semantics<parallel>], iteration_bounds = array<i64: 1>, scalar_prefetch = 0 : i64, scratch_operands = 2 : i64, tpu.core_type = #tpu.core_type<tc>, window_params = [{transform_indices = @transform_0, window_bounds = array<i64: 34>}, {transform_indices = @transform_1, window_bounds = array<i64: 2, 16, 16>}, {transform_indices = @transform_2, window_bounds = array<i64: 1, 16, 32>}]} {
    %cst = arith.constant 0.000000e+00 : f32
    %0 = vector.broadcast %cst : f32 to vector<20x44xf32>
    %c0 = arith.constant 0 : index
    %c0_0 = arith.constant 0 : index
    %1 = vector.load %arg4[%c0, %c0_0] : memref<20x44xf32, #tpu.memory_space<vmem>>, vector<20x44xf32>
    tpu.vector_store %arg4[%c0, %c0_0], %0 {strides = array<i32>} : memref<20x44xf32, #tpu.memory_space<vmem>>, vector<20x44xf32>,
    %cst_1 = arith.constant 0.000000e+00 : f32
    %2 = vector.broadcast %cst_1 : f32 to vector<20x44xf32>
    %c0_2 = arith.constant 0 : index
    %c0_3 = arith.constant 0 : index
    %3 = vector.load %arg5[%c0_2, %c0_3] : memref<20x44xf32, #tpu.memory_space<vmem>>, vector<20x44xf32>
    tpu.vector_store %arg5[%c0_2, %c0_3], %2 {strides = array<i32>} : memref<20x44xf32, #tpu.memory_space<vmem>>, vector<20x44xf32>,
    %c0_4 = arith.constant 0 : index
    %c0_5 = arith.constant 0 : index
    %c0_6 = arith.constant 0 : index
    %4 = vector.load %arg2[%c0_4, %c0_5, %c0_6] : memref<2x16x16xf32, #tpu.memory_space<vmem>>, vector<1x16x16xf32>
    %5 = vector.shape_cast %4 : vector<1x16x16xf32> to vector<16x16xf32>
    %c2 = arith.constant 2 : index
    %c2_7 = arith.constant 2 : index
    %6 = vector.load %arg4[%c2, %c2_7] : memref<20x44xf32, #tpu.memory_space<vmem>>, vector<16x16xf32>
    tpu.vector_store %arg4[%c2, %c2_7], %5 {strides = array<i32>} : memref<20x44xf32, #tpu.memory_space<vmem>>, vector<16x16xf32>,
    %c1 = arith.constant 1 : index
    %c0_8 = arith.constant 0 : index
    %c0_9 = arith.constant 0 : index
    %7 = vector.load %arg2[%c1, %c0_8, %c0_9] : memref<2x16x16xf32, #tpu.memory_space<vmem>>, vector<1x16x16xf32>
    %8 = vector.shape_cast %7 : vector<1x16x16xf32> to vector<16x16xf32>
    %c2_10 = arith.constant 2 : index
    %c22 = arith.constant 22 : index
    %9 = vector.load %arg4[%c2_10, %c22] : memref<20x44xf32, #tpu.memory_space<vmem>>, vector<16x16xf32>
    tpu.vector_store %arg4[%c2_10, %c22], %8 {strides = array<i32>} : memref<20x44xf32, #tpu.memory_space<vmem>>, vector<16x16xf32>,
    %10 = tpu.iota {dimensions = array<i32: 1>} : vector<16x40xi32>
    %c20_i32 = arith.constant 20 : i32
    %c0_i32 = arith.constant 0 : i32
    %11 = arith.cmpi eq, %c20_i32, %c0_i32 : i32
    %c1_i32 = arith.constant 1 : i32
    %12 = arith.select %11, %c1_i32, %c20_i32 : i32
    %13 = vector.broadcast %12 : i32 to vector<16x40xi32>
    %14 = arith.remsi %10, %13 : vector<16x40xi32>
    %c0_i32_11 = arith.constant 0 : i32
    %15 = vector.broadcast %c0_i32_11 : i32 to vector<16x40xi32>
    %16 = arith.cmpi ne, %14, %15 : vector<16x40xi32>
    %c0_i32_12 = arith.constant 0 : i32
    %17 = vector.broadcast %c0_i32_12 : i32 to vector<16x40xi32>
    %18 = arith.cmpi slt, %14, %17 : vector<16x40xi32>
    %c0_i32_13 = arith.constant 0 : i32
    %19 = arith.cmpi slt, %12, %c0_i32_13 : i32
    %20 = vector.broadcast %19 : i1 to vector<16x40xi1>
    %21 = vector.broadcast %20 : vector<16x40xi1> to vector<16x40xi1>
    %22 = arith.xori %18, %21 : vector<16x40xi1>
    %23 = arith.andi %22, %16 : vector<16x40xi1>
    %24 = vector.broadcast %12 : i32 to vector<16x40xi32>
    %25 = arith.addi %14, %24 : vector<16x40xi32>
    %26 = arith.select %23, %25, %14 : vector<16x40xi1>, vector<16x40xi32>
    %c16_i32 = arith.constant 16 : i32
    %27 = vector.broadcast %c16_i32 : i32 to vector<16x40xi32>
    %28 = arith.cmpi slt, %26, %27 : vector<16x40xi32>
    %cst_14 = arith.constant 0.000000e+00 : f32
    %29 = vector.broadcast %cst_14 : f32 to vector<16x40xf32>
    %c0_15 = arith.constant 0 : index
    %30 = memref.load %arg1[%c0_15] : memref<34xf32, #tpu.memory_space<smem>>
    %c1_16 = arith.constant 1 : index
    %c1_17 = arith.constant 1 : index
    %31 = vector.load %arg4[%c1_16, %c1_17] : memref<20x44xf32, #tpu.memory_space<vmem>>, vector<16x40xf32>
    %32 = vector.broadcast %30 : f32 to vector<16x40xf32>
    %33 = arith.mulf %32, %31 : vector<16x40xf32>
    %c1_18 = arith.constant 1 : index
    %34 = memref.load %arg1[%c1_18] : memref<34xf32, #tpu.memory_space<smem>>
    %c1_19 = arith.constant 1 : index
    %c2_20 = arith.constant 2 : index
    %35 = vector.load %arg4[%c1_19, %c2_20] : memref<20x44xf32, #tpu.memory_space<vmem>>, vector<16x40xf32>
    %36 = vector.broadcast %34 : f32 to vector<16x40xf32>
    %37 = arith.mulf %36, %35 : vector<16x40xf32>
    %c2_21 = arith.constant 2 : index
    %38 = memref.load %arg1[%c2_21] : memref<34xf32, #tpu.memory_space<smem>>
    %c1_22 = arith.constant 1 : index
    %c3 = arith.constant 3 : index
    %39 = vector.load %arg4[%c1_22, %c3] : memref<20x44xf32, #tpu.memory_space<vmem>>, vector<16x40xf32>
    %40 = vector.broadcast %38 : f32 to vector<16x40xf32>
    %41 = arith.mulf %40, %39 : vector<16x40xf32>
    %c3_23 = arith.constant 3 : index
    %42 = memref.load %arg1[%c3_23] : memref<34xf32, #tpu.memory_space<smem>>
    %c2_24 = arith.constant 2 : index
    %c1_25 = arith.constant 1 : index
    %43 = vector.load %arg4[%c2_24, %c1_25] : memref<20x44xf32, #tpu.memory_space<vmem>>, vector<16x40xf32>
    %44 = vector.broadcast %42 : f32 to vector<16x40xf32>
    %45 = arith.mulf %44, %43 : vector<16x40xf32>
    %c4 = arith.constant 4 : index
    %46 = memref.load %arg1[%c4] : memref<34xf32, #tpu.memory_space<smem>>
    %c2_26 = arith.constant 2 : index
    %c2_27 = arith.constant 2 : index
    %47 = vector.load %arg4[%c2_26, %c2_27] : memref<20x44xf32, #tpu.memory_space<vmem>>, vector<16x40xf32>
    %48 = vector.broadcast %46 : f32 to vector<16x40xf32>
    %49 = arith.mulf %48, %47 : vector<16x40xf32>
    %50 = arith.addf %33, %49 : vector<16x40xf32>
    %c5 = arith.constant 5 : index
    %51 = memref.load %arg1[%c5] : memref<34xf32, #tpu.memory_space<smem>>
    %c2_28 = arith.constant 2 : index
    %c3_29 = arith.constant 3 : index
    %52 = vector.load %arg4[%c2_28, %c3_29] : memref<20x44xf32, #tpu.memory_space<vmem>>, vector<16x40xf32>
    %53 = vector.broadcast %51 : f32 to vector<16x40xf32>
    %54 = arith.mulf %53, %52 : vector<16x40xf32>
    %55 = arith.addf %37, %54 : vector<16x40xf32>
    %c6 = arith.constant 6 : index
    %56 = memref.load %arg1[%c6] : memref<34xf32, #tpu.memory_space<smem>>
    %c3_30 = arith.constant 3 : index
    %c1_31 = arith.constant 1 : index
    %57 = vector.load %arg4[%c3_30, %c1_31] : memref<20x44xf32, #tpu.memory_space<vmem>>, vector<16x40xf32>
    %58 = vector.broadcast %56 : f32 to vector<16x40xf32>
    %59 = arith.mulf %58, %57 : vector<16x40xf32>
    %60 = arith.addf %41, %59 : vector<16x40xf32>
    %c7 = arith.constant 7 : index
    %61 = memref.load %arg1[%c7] : memref<34xf32, #tpu.memory_space<smem>>
    %c3_32 = arith.constant 3 : index
    %c2_33 = arith.constant 2 : index
    %62 = vector.load %arg4[%c3_32, %c2_33] : memref<20x44xf32, #tpu.memory_space<vmem>>, vector<16x40xf32>
    %63 = vector.broadcast %61 : f32 to vector<16x40xf32>
    %64 = arith.mulf %63, %62 : vector<16x40xf32>
    %65 = arith.addf %45, %64 : vector<16x40xf32>
    %c8 = arith.constant 8 : index
    %66 = memref.load %arg1[%c8] : memref<34xf32, #tpu.memory_space<smem>>
    %c3_34 = arith.constant 3 : index
    %c3_35 = arith.constant 3 : index
    %67 = vector.load %arg4[%c3_34, %c3_35] : memref<20x44xf32, #tpu.memory_space<vmem>>, vector<16x40xf32>
    %68 = vector.broadcast %66 : f32 to vector<16x40xf32>
    %69 = arith.mulf %68, %67 : vector<16x40xf32>
    %70 = arith.addf %50, %69 : vector<16x40xf32>
    %71 = arith.addf %70, %55 : vector<16x40xf32>
    %72 = arith.addf %71, %60 : vector<16x40xf32>
    %73 = arith.addf %72, %65 : vector<16x40xf32>
    %cst_36 = arith.constant 0.000000e+00 : f32
    %74 = vector.broadcast %cst_36 : f32 to vector<16x40xf32>
    %75 = arith.maximumf %73, %74 : vector<16x40xf32>
    %cst_37 = arith.constant 0.000000e+00 : f32
    %76 = vector.broadcast %cst_37 : f32 to vector<16x40xf32>
    %77 = arith.select %28, %75, %76 : vector<16x40xi1>, vector<16x40xf32>
    %c2_38 = arith.constant 2 : index
    %c2_39 = arith.constant 2 : index
    %78 = vector.load %arg5[%c2_38, %c2_39] : memref<20x44xf32, #tpu.memory_space<vmem>>, vector<16x40xf32>
    tpu.vector_store %arg5[%c2_38, %c2_39], %77 {strides = array<i32>} : memref<20x44xf32, #tpu.memory_space<vmem>>, vector<16x40xf32>,
    %c0_40 = arith.constant 0 : index
    %79 = memref.load %arg1[%c0_40] : memref<34xf32, #tpu.memory_space<smem>>
    %c1_41 = arith.constant 1 : index
    %c1_42 = arith.constant 1 : index
    %80 = vector.load %arg5[%c1_41, %c1_42] : memref<20x44xf32, #tpu.memory_space<vmem>>, vector<16x40xf32>
    %81 = vector.broadcast %79 : f32 to vector<16x40xf32>
    %82 = arith.mulf %81, %80 : vector<16x40xf32>
    %c1_43 = arith.constant 1 : index
    %83 = memref.load %arg1[%c1_43] : memref<34xf32, #tpu.memory_space<smem>>
    %c1_44 = arith.constant 1 : index
    %c2_45 = arith.constant 2 : index
    %84 = vector.load %arg5[%c1_44, %c2_45] : memref<20x44xf32, #tpu.memory_space<vmem>>, vector<16x40xf32>
    %85 = vector.broadcast %83 : f32 to vector<16x40xf32>
    %86 = arith.mulf %85, %84 : vector<16x40xf32>
    %c2_46 = arith.constant 2 : index
    %87 = memref.load %arg1[%c2_46] : memref<34xf32, #tpu.memory_space<smem>>
    %c1_47 = arith.constant 1 : index
    %c3_48 = arith.constant 3 : index
    %88 = vector.load %arg5[%c1_47, %c3_48] : memref<20x44xf32, #tpu.memory_space<vmem>>, vector<16x40xf32>
    %89 = vector.broadcast %87 : f32 to vector<16x40xf32>
    %90 = arith.mulf %89, %88 : vector<16x40xf32>
    %c3_49 = arith.constant 3 : index
    %91 = memref.load %arg1[%c3_49] : memref<34xf32, #tpu.memory_space<smem>>
    %c2_50 = arith.constant 2 : index
    %c1_51 = arith.constant 1 : index
    %92 = vector.load %arg5[%c2_50, %c1_51] : memref<20x44xf32, #tpu.memory_space<vmem>>, vector<16x40xf32>
    %93 = vector.broadcast %91 : f32 to vector<16x40xf32>
    %94 = arith.mulf %93, %92 : vector<16x40xf32>
    %c4_52 = arith.constant 4 : index
    %95 = memref.load %arg1[%c4_52] : memref<34xf32, #tpu.memory_space<smem>>
    %c2_53 = arith.constant 2 : index
    %c2_54 = arith.constant 2 : index
    %96 = vector.load %arg5[%c2_53, %c2_54] : memref<20x44xf32, #tpu.memory_space<vmem>>, vector<16x40xf32>
    %97 = vector.broadcast %95 : f32 to vector<16x40xf32>
    %98 = arith.mulf %97, %96 : vector<16x40xf32>
    %99 = arith.addf %82, %98 : vector<16x40xf32>
    %c5_55 = arith.constant 5 : index
    %100 = memref.load %arg1[%c5_55] : memref<34xf32, #tpu.memory_space<smem>>
    %c2_56 = arith.constant 2 : index
    %c3_57 = arith.constant 3 : index
    %101 = vector.load %arg5[%c2_56, %c3_57] : memref<20x44xf32, #tpu.memory_space<vmem>>, vector<16x40xf32>
    %102 = vector.broadcast %100 : f32 to vector<16x40xf32>
    %103 = arith.mulf %102, %101 : vector<16x40xf32>
    %104 = arith.addf %86, %103 : vector<16x40xf32>
    %c6_58 = arith.constant 6 : index
    %105 = memref.load %arg1[%c6_58] : memref<34xf32, #tpu.memory_space<smem>>
    %c3_59 = arith.constant 3 : index
    %c1_60 = arith.constant 1 : index
    %106 = vector.load %arg5[%c3_59, %c1_60] : memref<20x44xf32, #tpu.memory_space<vmem>>, vector<16x40xf32>
    %107 = vector.broadcast %105 : f32 to vector<16x40xf32>
    %108 = arith.mulf %107, %106 : vector<16x40xf32>
    %109 = arith.addf %90, %108 : vector<16x40xf32>
    %c7_61 = arith.constant 7 : index
    %110 = memref.load %arg1[%c7_61] : memref<34xf32, #tpu.memory_space<smem>>
    %c3_62 = arith.constant 3 : index
    %c2_63 = arith.constant 2 : index
    %111 = vector.load %arg5[%c3_62, %c2_63] : memref<20x44xf32, #tpu.memory_space<vmem>>, vector<16x40xf32>
    %112 = vector.broadcast %110 : f32 to vector<16x40xf32>
    %113 = arith.mulf %112, %111 : vector<16x40xf32>
    %114 = arith.addf %94, %113 : vector<16x40xf32>
    %c8_64 = arith.constant 8 : index
    %115 = memref.load %arg1[%c8_64] : memref<34xf32, #tpu.memory_space<smem>>
    %c3_65 = arith.constant 3 : index
    %c3_66 = arith.constant 3 : index
    %116 = vector.load %arg5[%c3_65, %c3_66] : memref<20x44xf32, #tpu.memory_space<vmem>>, vector<16x40xf32>
    %117 = vector.broadcast %115 : f32 to vector<16x40xf32>
    %118 = arith.mulf %117, %116 : vector<16x40xf32>
    %119 = arith.addf %99, %118 : vector<16x40xf32>
    %120 = arith.addf %119, %104 : vector<16x40xf32>
    %121 = arith.addf %120, %109 : vector<16x40xf32>
    %122 = arith.addf %121, %114 : vector<16x40xf32>
    %123 = arith.addf %29, %122 : vector<16x40xf32>
    %c9 = arith.constant 9 : index
    %124 = memref.load %arg1[%c9] : memref<34xf32, #tpu.memory_space<smem>>
    %c0_67 = arith.constant 0 : index
    %c0_68 = arith.constant 0 : index
    %125 = vector.load %arg4[%c0_67, %c0_68] : memref<20x44xf32, #tpu.memory_space<vmem>>, vector<16x40xf32>
    %126 = vector.broadcast %124 : f32 to vector<16x40xf32>
    %127 = arith.mulf %126, %125 : vector<16x40xf32>
    %c10 = arith.constant 10 : index
    %128 = memref.load %arg1[%c10] : memref<34xf32, #tpu.memory_space<smem>>
    %c0_69 = arith.constant 0 : index
    %c1_70 = arith.constant 1 : index
    %129 = vector.load %arg4[%c0_69, %c1_70] : memref<20x44xf32, #tpu.memory_space<vmem>>, vector<16x40xf32>
    %130 = vector.broadcast %128 : f32 to vector<16x40xf32>
    %131 = arith.mulf %130, %129 : vector<16x40xf32>
    %c11 = arith.constant 11 : index
    %132 = memref.load %arg1[%c11] : memref<34xf32, #tpu.memory_space<smem>>
    %c0_71 = arith.constant 0 : index
    %c2_72 = arith.constant 2 : index
    %133 = vector.load %arg4[%c0_71, %c2_72] : memref<20x44xf32, #tpu.memory_space<vmem>>, vector<16x40xf32>
    %134 = vector.broadcast %132 : f32 to vector<16x40xf32>
    %135 = arith.mulf %134, %133 : vector<16x40xf32>
    %c12 = arith.constant 12 : index
    %136 = memref.load %arg1[%c12] : memref<34xf32, #tpu.memory_space<smem>>
    %c0_73 = arith.constant 0 : index
    %c3_74 = arith.constant 3 : index
    %137 = vector.load %arg4[%c0_73, %c3_74] : memref<20x44xf32, #tpu.memory_space<vmem>>, vector<16x40xf32>
    %138 = vector.broadcast %136 : f32 to vector<16x40xf32>
    %139 = arith.mulf %138, %137 : vector<16x40xf32>
    %c13 = arith.constant 13 : index
    %140 = memref.load %arg1[%c13] : memref<34xf32, #tpu.memory_space<smem>>
    %c0_75 = arith.constant 0 : index
    %c4_76 = arith.constant 4 : index
    %141 = vector.load %arg4[%c0_75, %c4_76] : memref<20x44xf32, #tpu.memory_space<vmem>>, vector<16x40xf32>
    %142 = vector.broadcast %140 : f32 to vector<16x40xf32>
    %143 = arith.mulf %142, %141 : vector<16x40xf32>
    %144 = arith.addf %127, %143 : vector<16x40xf32>
    %c14 = arith.constant 14 : index
    %145 = memref.load %arg1[%c14] : memref<34xf32, #tpu.memory_space<smem>>
    %c1_77 = arith.constant 1 : index
    %c0_78 = arith.constant 0 : index
    %146 = vector.load %arg4[%c1_77, %c0_78] : memref<20x44xf32, #tpu.memory_space<vmem>>, vector<16x40xf32>
    %147 = vector.broadcast %145 : f32 to vector<16x40xf32>
    %148 = arith.mulf %147, %146 : vector<16x40xf32>
    %149 = arith.addf %131, %148 : vector<16x40xf32>
    %c15 = arith.constant 15 : index
    %150 = memref.load %arg1[%c15] : memref<34xf32, #tpu.memory_space<smem>>
    %c1_79 = arith.constant 1 : index
    %c1_80 = arith.constant 1 : index
    %151 = vector.load %arg4[%c1_79, %c1_80] : memref<20x44xf32, #tpu.memory_space<vmem>>, vector<16x40xf32>
    %152 = vector.broadcast %150 : f32 to vector<16x40xf32>
    %153 = arith.mulf %152, %151 : vector<16x40xf32>
    %154 = arith.addf %135, %153 : vector<16x40xf32>
    %c16 = arith.constant 16 : index
    %155 = memref.load %arg1[%c16] : memref<34xf32, #tpu.memory_space<smem>>
    %c1_81 = arith.constant 1 : index
    %c2_82 = arith.constant 2 : index
    %156 = vector.load %arg4[%c1_81, %c2_82] : memref<20x44xf32, #tpu.memory_space<vmem>>, vector<16x40xf32>
    %157 = vector.broadcast %155 : f32 to vector<16x40xf32>
    %158 = arith.mulf %157, %156 : vector<16x40xf32>
    %159 = arith.addf %139, %158 : vector<16x40xf32>
    %c17 = arith.constant 17 : index
    %160 = memref.load %arg1[%c17] : memref<34xf32, #tpu.memory_space<smem>>
    %c1_83 = arith.constant 1 : index
    %c3_84 = arith.constant 3 : index
    %161 = vector.load %arg4[%c1_83, %c3_84] : memref<20x44xf32, #tpu.memory_space<vmem>>, vector<16x40xf32>
    %162 = vector.broadcast %160 : f32 to vector<16x40xf32>
    %163 = arith.mulf %162, %161 : vector<16x40xf32>
    %164 = arith.addf %144, %163 : vector<16x40xf32>
    %c18 = arith.constant 18 : index
    %165 = memref.load %arg1[%c18] : memref<34xf32, #tpu.memory_space<smem>>
    %c1_85 = arith.constant 1 : index
    %c4_86 = arith.constant 4 : index
    %166 = vector.load %arg4[%c1_85, %c4_86] : memref<20x44xf32, #tpu.memory_space<vmem>>, vector<16x40xf32>
    %167 = vector.broadcast %165 : f32 to vector<16x40xf32>
    %168 = arith.mulf %167, %166 : vector<16x40xf32>
    %169 = arith.addf %149, %168 : vector<16x40xf32>
    %c19 = arith.constant 19 : index
    %170 = memref.load %arg1[%c19] : memref<34xf32, #tpu.memory_space<smem>>
    %c2_87 = arith.constant 2 : index
    %c0_88 = arith.constant 0 : index
    %171 = vector.load %arg4[%c2_87, %c0_88] : memref<20x44xf32, #tpu.memory_space<vmem>>, vector<16x40xf32>
    %172 = vector.broadcast %170 : f32 to vector<16x40xf32>
    %173 = arith.mulf %172, %171 : vector<16x40xf32>
    %174 = arith.addf %154, %173 : vector<16x40xf32>
    %c20 = arith.constant 20 : index
    %175 = memref.load %arg1[%c20] : memref<34xf32, #tpu.memory_space<smem>>
    %c2_89 = arith.constant 2 : index
    %c1_90 = arith.constant 1 : index
    %176 = vector.load %arg4[%c2_89, %c1_90] : memref<20x44xf32, #tpu.memory_space<vmem>>, vector<16x40xf32>
    %177 = vector.broadcast %175 : f32 to vector<16x40xf32>
    %178 = arith.mulf %177, %176 : vector<16x40xf32>
    %179 = arith.addf %159, %178 : vector<16x40xf32>
    %c21 = arith.constant 21 : index
    %180 = memref.load %arg1[%c21] : memref<34xf32, #tpu.memory_space<smem>>
    %c2_91 = arith.constant 2 : index
    %c2_92 = arith.constant 2 : index
    %181 = vector.load %arg4[%c2_91, %c2_92] : memref<20x44xf32, #tpu.memory_space<vmem>>, vector<16x40xf32>
    %182 = vector.broadcast %180 : f32 to vector<16x40xf32>
    %183 = arith.mulf %182, %181 : vector<16x40xf32>
    %184 = arith.addf %164, %183 : vector<16x40xf32>
    %c22_93 = arith.constant 22 : index
    %185 = memref.load %arg1[%c22_93] : memref<34xf32, #tpu.memory_space<smem>>
    %c2_94 = arith.constant 2 : index
    %c3_95 = arith.constant 3 : index
    %186 = vector.load %arg4[%c2_94, %c3_95] : memref<20x44xf32, #tpu.memory_space<vmem>>, vector<16x40xf32>
    %187 = vector.broadcast %185 : f32 to vector<16x40xf32>
    %188 = arith.mulf %187, %186 : vector<16x40xf32>
    %189 = arith.addf %169, %188 : vector<16x40xf32>
    %c23 = arith.constant 23 : index
    %190 = memref.load %arg1[%c23] : memref<34xf32, #tpu.memory_space<smem>>
    %c2_96 = arith.constant 2 : index
    %c4_97 = arith.constant 4 : index
    %191 = vector.load %arg4[%c2_96, %c4_97] : memref<20x44xf32, #tpu.memory_space<vmem>>, vector<16x40xf32>
    %192 = vector.broadcast %190 : f32 to vector<16x40xf32>
    %193 = arith.mulf %192, %191 : vector<16x40xf32>
    %194 = arith.addf %174, %193 : vector<16x40xf32>
    %c24 = arith.constant 24 : index
    %195 = memref.load %arg1[%c24] : memref<34xf32, #tpu.memory_space<smem>>
    %c3_98 = arith.constant 3 : index
    %c0_99 = arith.constant 0 : index
    %196 = vector.load %arg4[%c3_98, %c0_99] : memref<20x44xf32, #tpu.memory_space<vmem>>, vector<16x40xf32>
    %197 = vector.broadcast %195 : f32 to vector<16x40xf32>
    %198 = arith.mulf %197, %196 : vector<16x40xf32>
    %199 = arith.addf %179, %198 : vector<16x40xf32>
    %c25 = arith.constant 25 : index
    %200 = memref.load %arg1[%c25] : memref<34xf32, #tpu.memory_space<smem>>
    %c3_100 = arith.constant 3 : index
    %c1_101 = arith.constant 1 : index
    %201 = vector.load %arg4[%c3_100, %c1_101] : memref<20x44xf32, #tpu.memory_space<vmem>>, vector<16x40xf32>
    %202 = vector.broadcast %200 : f32 to vector<16x40xf32>
    %203 = arith.mulf %202, %201 : vector<16x40xf32>
    %204 = arith.addf %184, %203 : vector<16x40xf32>
    %c26 = arith.constant 26 : index
    %205 = memref.load %arg1[%c26] : memref<34xf32, #tpu.memory_space<smem>>
    %c3_102 = arith.constant 3 : index
    %c2_103 = arith.constant 2 : index
    %206 = vector.load %arg4[%c3_102, %c2_103] : memref<20x44xf32, #tpu.memory_space<vmem>>, vector<16x40xf32>
    %207 = vector.broadcast %205 : f32 to vector<16x40xf32>
    %208 = arith.mulf %207, %206 : vector<16x40xf32>
    %209 = arith.addf %189, %208 : vector<16x40xf32>
    %c27 = arith.constant 27 : index
    %210 = memref.load %arg1[%c27] : memref<34xf32, #tpu.memory_space<smem>>
    %c3_104 = arith.constant 3 : index
    %c3_105 = arith.constant 3 : index
    %211 = vector.load %arg4[%c3_104, %c3_105] : memref<20x44xf32, #tpu.memory_space<vmem>>, vector<16x40xf32>
    %212 = vector.broadcast %210 : f32 to vector<16x40xf32>
    %213 = arith.mulf %212, %211 : vector<16x40xf32>
    %214 = arith.addf %194, %213 : vector<16x40xf32>
    %c28 = arith.constant 28 : index
    %215 = memref.load %arg1[%c28] : memref<34xf32, #tpu.memory_space<smem>>
    %c3_106 = arith.constant 3 : index
    %c4_107 = arith.constant 4 : index
    %216 = vector.load %arg4[%c3_106, %c4_107] : memref<20x44xf32, #tpu.memory_space<vmem>>, vector<16x40xf32>
    %217 = vector.broadcast %215 : f32 to vector<16x40xf32>
    %218 = arith.mulf %217, %216 : vector<16x40xf32>
    %219 = arith.addf %199, %218 : vector<16x40xf32>
    %c29 = arith.constant 29 : index
    %220 = memref.load %arg1[%c29] : memref<34xf32, #tpu.memory_space<smem>>
    %c4_108 = arith.constant 4 : index
    %c0_109 = arith.constant 0 : index
    %221 = vector.load %arg4[%c4_108, %c0_109] : memref<20x44xf32, #tpu.memory_space<vmem>>, vector<16x40xf32>
    %222 = vector.broadcast %220 : f32 to vector<16x40xf32>
    %223 = arith.mulf %222, %221 : vector<16x40xf32>
    %224 = arith.addf %204, %223 : vector<16x40xf32>
    %c30 = arith.constant 30 : index
    %225 = memref.load %arg1[%c30] : memref<34xf32, #tpu.memory_space<smem>>
    %c4_110 = arith.constant 4 : index
    %c1_111 = arith.constant 1 : index
    %226 = vector.load %arg4[%c4_110, %c1_111] : memref<20x44xf32, #tpu.memory_space<vmem>>, vector<16x40xf32>
    %227 = vector.broadcast %225 : f32 to vector<16x40xf32>
    %228 = arith.mulf %227, %226 : vector<16x40xf32>
    %229 = arith.addf %209, %228 : vector<16x40xf32>
    %c31 = arith.constant 31 : index
    %230 = memref.load %arg1[%c31] : memref<34xf32, #tpu.memory_space<smem>>
    %c4_112 = arith.constant 4 : index
    %c2_113 = arith.constant 2 : index
    %231 = vector.load %arg4[%c4_112, %c2_113] : memref<20x44xf32, #tpu.memory_space<vmem>>, vector<16x40xf32>
    %232 = vector.broadcast %230 : f32 to vector<16x40xf32>
    %233 = arith.mulf %232, %231 : vector<16x40xf32>
    %234 = arith.addf %214, %233 : vector<16x40xf32>
    %c32 = arith.constant 32 : index
    %235 = memref.load %arg1[%c32] : memref<34xf32, #tpu.memory_space<smem>>
    %c4_114 = arith.constant 4 : index
    %c3_115 = arith.constant 3 : index
    %236 = vector.load %arg4[%c4_114, %c3_115] : memref<20x44xf32, #tpu.memory_space<vmem>>, vector<16x40xf32>
    %237 = vector.broadcast %235 : f32 to vector<16x40xf32>
    %238 = arith.mulf %237, %236 : vector<16x40xf32>
    %239 = arith.addf %219, %238 : vector<16x40xf32>
    %c33 = arith.constant 33 : index
    %240 = memref.load %arg1[%c33] : memref<34xf32, #tpu.memory_space<smem>>
    %c4_116 = arith.constant 4 : index
    %c4_117 = arith.constant 4 : index
    %241 = vector.load %arg4[%c4_116, %c4_117] : memref<20x44xf32, #tpu.memory_space<vmem>>, vector<16x40xf32>
    %242 = vector.broadcast %240 : f32 to vector<16x40xf32>
    %243 = arith.mulf %242, %241 : vector<16x40xf32>
    %244 = arith.addf %224, %243 : vector<16x40xf32>
    %245 = arith.addf %244, %229 : vector<16x40xf32>
    %246 = arith.addf %245, %234 : vector<16x40xf32>
    %247 = arith.addf %246, %239 : vector<16x40xf32>
    %cst_118 = arith.constant 0.000000e+00 : f32
    %248 = vector.broadcast %cst_118 : f32 to vector<16x40xf32>
    %249 = arith.maximumf %247, %248 : vector<16x40xf32>
    %cst_119 = arith.constant 0.000000e+00 : f32
    %250 = vector.broadcast %cst_119 : f32 to vector<16x40xf32>
    %251 = arith.select %28, %249, %250 : vector<16x40xi1>, vector<16x40xf32>
    %c2_120 = arith.constant 2 : index
    %c2_121 = arith.constant 2 : index
    %252 = vector.load %arg5[%c2_120, %c2_121] : memref<20x44xf32, #tpu.memory_space<vmem>>, vector<16x40xf32>
    tpu.vector_store %arg5[%c2_120, %c2_121], %251 {strides = array<i32>} : memref<20x44xf32, #tpu.memory_space<vmem>>, vector<16x40xf32>,
    %c9_122 = arith.constant 9 : index
    %253 = memref.load %arg1[%c9_122] : memref<34xf32, #tpu.memory_space<smem>>
    %c0_123 = arith.constant 0 : index
    %c0_124 = arith.constant 0 : index
    %254 = vector.load %arg5[%c0_123, %c0_124] : memref<20x44xf32, #tpu.memory_space<vmem>>, vector<16x40xf32>
    %255 = vector.broadcast %253 : f32 to vector<16x40xf32>
    %256 = arith.mulf %255, %254 : vector<16x40xf32>
    %c10_125 = arith.constant 10 : index
    %257 = memref.load %arg1[%c10_125] : memref<34xf32, #tpu.memory_space<smem>>
    %c0_126 = arith.constant 0 : index
    %c1_127 = arith.constant 1 : index
    %258 = vector.load %arg5[%c0_126, %c1_127] : memref<20x44xf32, #tpu.memory_space<vmem>>, vector<16x40xf32>
    %259 = vector.broadcast %257 : f32 to vector<16x40xf32>
    %260 = arith.mulf %259, %258 : vector<16x40xf32>
    %c11_128 = arith.constant 11 : index
    %261 = memref.load %arg1[%c11_128] : memref<34xf32, #tpu.memory_space<smem>>
    %c0_129 = arith.constant 0 : index
    %c2_130 = arith.constant 2 : index
    %262 = vector.load %arg5[%c0_129, %c2_130] : memref<20x44xf32, #tpu.memory_space<vmem>>, vector<16x40xf32>
    %263 = vector.broadcast %261 : f32 to vector<16x40xf32>
    %264 = arith.mulf %263, %262 : vector<16x40xf32>
    %c12_131 = arith.constant 12 : index
    %265 = memref.load %arg1[%c12_131] : memref<34xf32, #tpu.memory_space<smem>>
    %c0_132 = arith.constant 0 : index
    %c3_133 = arith.constant 3 : index
    %266 = vector.load %arg5[%c0_132, %c3_133] : memref<20x44xf32, #tpu.memory_space<vmem>>, vector<16x40xf32>
    %267 = vector.broadcast %265 : f32 to vector<16x40xf32>
    %268 = arith.mulf %267, %266 : vector<16x40xf32>
    %c13_134 = arith.constant 13 : index
    %269 = memref.load %arg1[%c13_134] : memref<34xf32, #tpu.memory_space<smem>>
    %c0_135 = arith.constant 0 : index
    %c4_136 = arith.constant 4 : index
    %270 = vector.load %arg5[%c0_135, %c4_136] : memref<20x44xf32, #tpu.memory_space<vmem>>, vector<16x40xf32>
    %271 = vector.broadcast %269 : f32 to vector<16x40xf32>
    %272 = arith.mulf %271, %270 : vector<16x40xf32>
    %273 = arith.addf %256, %272 : vector<16x40xf32>
    %c14_137 = arith.constant 14 : index
    %274 = memref.load %arg1[%c14_137] : memref<34xf32, #tpu.memory_space<smem>>
    %c1_138 = arith.constant 1 : index
    %c0_139 = arith.constant 0 : index
    %275 = vector.load %arg5[%c1_138, %c0_139] : memref<20x44xf32, #tpu.memory_space<vmem>>, vector<16x40xf32>
    %276 = vector.broadcast %274 : f32 to vector<16x40xf32>
    %277 = arith.mulf %276, %275 : vector<16x40xf32>
    %278 = arith.addf %260, %277 : vector<16x40xf32>
    %c15_140 = arith.constant 15 : index
    %279 = memref.load %arg1[%c15_140] : memref<34xf32, #tpu.memory_space<smem>>
    %c1_141 = arith.constant 1 : index
    %c1_142 = arith.constant 1 : index
    %280 = vector.load %arg5[%c1_141, %c1_142] : memref<20x44xf32, #tpu.memory_space<vmem>>, vector<16x40xf32>
    %281 = vector.broadcast %279 : f32 to vector<16x40xf32>
    %282 = arith.mulf %281, %280 : vector<16x40xf32>
    %283 = arith.addf %264, %282 : vector<16x40xf32>
    %c16_143 = arith.constant 16 : index
    %284 = memref.load %arg1[%c16_143] : memref<34xf32, #tpu.memory_space<smem>>
    %c1_144 = arith.constant 1 : index
    %c2_145 = arith.constant 2 : index
    %285 = vector.load %arg5[%c1_144, %c2_145] : memref<20x44xf32, #tpu.memory_space<vmem>>, vector<16x40xf32>
    %286 = vector.broadcast %284 : f32 to vector<16x40xf32>
    %287 = arith.mulf %286, %285 : vector<16x40xf32>
    %288 = arith.addf %268, %287 : vector<16x40xf32>
    %c17_146 = arith.constant 17 : index
    %289 = memref.load %arg1[%c17_146] : memref<34xf32, #tpu.memory_space<smem>>
    %c1_147 = arith.constant 1 : index
    %c3_148 = arith.constant 3 : index
    %290 = vector.load %arg5[%c1_147, %c3_148] : memref<20x44xf32, #tpu.memory_space<vmem>>, vector<16x40xf32>
    %291 = vector.broadcast %289 : f32 to vector<16x40xf32>
    %292 = arith.mulf %291, %290 : vector<16x40xf32>
    %293 = arith.addf %273, %292 : vector<16x40xf32>
    %c18_149 = arith.constant 18 : index
    %294 = memref.load %arg1[%c18_149] : memref<34xf32, #tpu.memory_space<smem>>
    %c1_150 = arith.constant 1 : index
    %c4_151 = arith.constant 4 : index
    %295 = vector.load %arg5[%c1_150, %c4_151] : memref<20x44xf32, #tpu.memory_space<vmem>>, vector<16x40xf32>
    %296 = vector.broadcast %294 : f32 to vector<16x40xf32>
    %297 = arith.mulf %296, %295 : vector<16x40xf32>
    %298 = arith.addf %278, %297 : vector<16x40xf32>
    %c19_152 = arith.constant 19 : index
    %299 = memref.load %arg1[%c19_152] : memref<34xf32, #tpu.memory_space<smem>>
    %c2_153 = arith.constant 2 : index
    %c0_154 = arith.constant 0 : index
    %300 = vector.load %arg5[%c2_153, %c0_154] : memref<20x44xf32, #tpu.memory_space<vmem>>, vector<16x40xf32>
    %301 = vector.broadcast %299 : f32 to vector<16x40xf32>
    %302 = arith.mulf %301, %300 : vector<16x40xf32>
    %303 = arith.addf %283, %302 : vector<16x40xf32>
    %c20_155 = arith.constant 20 : index
    %304 = memref.load %arg1[%c20_155] : memref<34xf32, #tpu.memory_space<smem>>
    %c2_156 = arith.constant 2 : index
    %c1_157 = arith.constant 1 : index
    %305 = vector.load %arg5[%c2_156, %c1_157] : memref<20x44xf32, #tpu.memory_space<vmem>>, vector<16x40xf32>
    %306 = vector.broadcast %304 : f32 to vector<16x40xf32>
    %307 = arith.mulf %306, %305 : vector<16x40xf32>
    %308 = arith.addf %288, %307 : vector<16x40xf32>
    %c21_158 = arith.constant 21 : index
    %309 = memref.load %arg1[%c21_158] : memref<34xf32, #tpu.memory_space<smem>>
    %c2_159 = arith.constant 2 : index
    %c2_160 = arith.constant 2 : index
    %310 = vector.load %arg5[%c2_159, %c2_160] : memref<20x44xf32, #tpu.memory_space<vmem>>, vector<16x40xf32>
    %311 = vector.broadcast %309 : f32 to vector<16x40xf32>
    %312 = arith.mulf %311, %310 : vector<16x40xf32>
    %313 = arith.addf %293, %312 : vector<16x40xf32>
    %c22_161 = arith.constant 22 : index
    %314 = memref.load %arg1[%c22_161] : memref<34xf32, #tpu.memory_space<smem>>
    %c2_162 = arith.constant 2 : index
    %c3_163 = arith.constant 3 : index
    %315 = vector.load %arg5[%c2_162, %c3_163] : memref<20x44xf32, #tpu.memory_space<vmem>>, vector<16x40xf32>
    %316 = vector.broadcast %314 : f32 to vector<16x40xf32>
    %317 = arith.mulf %316, %315 : vector<16x40xf32>
    %318 = arith.addf %298, %317 : vector<16x40xf32>
    %c23_164 = arith.constant 23 : index
    %319 = memref.load %arg1[%c23_164] : memref<34xf32, #tpu.memory_space<smem>>
    %c2_165 = arith.constant 2 : index
    %c4_166 = arith.constant 4 : index
    %320 = vector.load %arg5[%c2_165, %c4_166] : memref<20x44xf32, #tpu.memory_space<vmem>>, vector<16x40xf32>
    %321 = vector.broadcast %319 : f32 to vector<16x40xf32>
    %322 = arith.mulf %321, %320 : vector<16x40xf32>
    %323 = arith.addf %303, %322 : vector<16x40xf32>
    %c24_167 = arith.constant 24 : index
    %324 = memref.load %arg1[%c24_167] : memref<34xf32, #tpu.memory_space<smem>>
    %c3_168 = arith.constant 3 : index
    %c0_169 = arith.constant 0 : index
    %325 = vector.load %arg5[%c3_168, %c0_169] : memref<20x44xf32, #tpu.memory_space<vmem>>, vector<16x40xf32>
    %326 = vector.broadcast %324 : f32 to vector<16x40xf32>
    %327 = arith.mulf %326, %325 : vector<16x40xf32>
    %328 = arith.addf %308, %327 : vector<16x40xf32>
    %c25_170 = arith.constant 25 : index
    %329 = memref.load %arg1[%c25_170] : memref<34xf32, #tpu.memory_space<smem>>
    %c3_171 = arith.constant 3 : index
    %c1_172 = arith.constant 1 : index
    %330 = vector.load %arg5[%c3_171, %c1_172] : memref<20x44xf32, #tpu.memory_space<vmem>>, vector<16x40xf32>
    %331 = vector.broadcast %329 : f32 to vector<16x40xf32>
    %332 = arith.mulf %331, %330 : vector<16x40xf32>
    %333 = arith.addf %313, %332 : vector<16x40xf32>
    %c26_173 = arith.constant 26 : index
    %334 = memref.load %arg1[%c26_173] : memref<34xf32, #tpu.memory_space<smem>>
    %c3_174 = arith.constant 3 : index
    %c2_175 = arith.constant 2 : index
    %335 = vector.load %arg5[%c3_174, %c2_175] : memref<20x44xf32, #tpu.memory_space<vmem>>, vector<16x40xf32>
    %336 = vector.broadcast %334 : f32 to vector<16x40xf32>
    %337 = arith.mulf %336, %335 : vector<16x40xf32>
    %338 = arith.addf %318, %337 : vector<16x40xf32>
    %c27_176 = arith.constant 27 : index
    %339 = memref.load %arg1[%c27_176] : memref<34xf32, #tpu.memory_space<smem>>
    %c3_177 = arith.constant 3 : index
    %c3_178 = arith.constant 3 : index
    %340 = vector.load %arg5[%c3_177, %c3_178] : memref<20x44xf32, #tpu.memory_space<vmem>>, vector<16x40xf32>
    %341 = vector.broadcast %339 : f32 to vector<16x40xf32>
    %342 = arith.mulf %341, %340 : vector<16x40xf32>
    %343 = arith.addf %323, %342 : vector<16x40xf32>
    %c28_179 = arith.constant 28 : index
    %344 = memref.load %arg1[%c28_179] : memref<34xf32, #tpu.memory_space<smem>>
    %c3_180 = arith.constant 3 : index
    %c4_181 = arith.constant 4 : index
    %345 = vector.load %arg5[%c3_180, %c4_181] : memref<20x44xf32, #tpu.memory_space<vmem>>, vector<16x40xf32>
    %346 = vector.broadcast %344 : f32 to vector<16x40xf32>
    %347 = arith.mulf %346, %345 : vector<16x40xf32>
    %348 = arith.addf %328, %347 : vector<16x40xf32>
    %c29_182 = arith.constant 29 : index
    %349 = memref.load %arg1[%c29_182] : memref<34xf32, #tpu.memory_space<smem>>
    %c4_183 = arith.constant 4 : index
    %c0_184 = arith.constant 0 : index
    %350 = vector.load %arg5[%c4_183, %c0_184] : memref<20x44xf32, #tpu.memory_space<vmem>>, vector<16x40xf32>
    %351 = vector.broadcast %349 : f32 to vector<16x40xf32>
    %352 = arith.mulf %351, %350 : vector<16x40xf32>
    %353 = arith.addf %333, %352 : vector<16x40xf32>
    %c30_185 = arith.constant 30 : index
    %354 = memref.load %arg1[%c30_185] : memref<34xf32, #tpu.memory_space<smem>>
    %c4_186 = arith.constant 4 : index
    %c1_187 = arith.constant 1 : index
    %355 = vector.load %arg5[%c4_186, %c1_187] : memref<20x44xf32, #tpu.memory_space<vmem>>, vector<16x40xf32>
    %356 = vector.broadcast %354 : f32 to vector<16x40xf32>
    %357 = arith.mulf %356, %355 : vector<16x40xf32>
    %358 = arith.addf %338, %357 : vector<16x40xf32>
    %c31_188 = arith.constant 31 : index
    %359 = memref.load %arg1[%c31_188] : memref<34xf32, #tpu.memory_space<smem>>
    %c4_189 = arith.constant 4 : index
    %c2_190 = arith.constant 2 : index
    %360 = vector.load %arg5[%c4_189, %c2_190] : memref<20x44xf32, #tpu.memory_space<vmem>>, vector<16x40xf32>
    %361 = vector.broadcast %359 : f32 to vector<16x40xf32>
    %362 = arith.mulf %361, %360 : vector<16x40xf32>
    %363 = arith.addf %343, %362 : vector<16x40xf32>
    %c32_191 = arith.constant 32 : index
    %364 = memref.load %arg1[%c32_191] : memref<34xf32, #tpu.memory_space<smem>>
    %c4_192 = arith.constant 4 : index
    %c3_193 = arith.constant 3 : index
    %365 = vector.load %arg5[%c4_192, %c3_193] : memref<20x44xf32, #tpu.memory_space<vmem>>, vector<16x40xf32>
    %366 = vector.broadcast %364 : f32 to vector<16x40xf32>
    %367 = arith.mulf %366, %365 : vector<16x40xf32>
    %368 = arith.addf %348, %367 : vector<16x40xf32>
    %c33_194 = arith.constant 33 : index
    %369 = memref.load %arg1[%c33_194] : memref<34xf32, #tpu.memory_space<smem>>
    %c4_195 = arith.constant 4 : index
    %c4_196 = arith.constant 4 : index
    %370 = vector.load %arg5[%c4_195, %c4_196] : memref<20x44xf32, #tpu.memory_space<vmem>>, vector<16x40xf32>
    %371 = vector.broadcast %369 : f32 to vector<16x40xf32>
    %372 = arith.mulf %371, %370 : vector<16x40xf32>
    %373 = arith.addf %353, %372 : vector<16x40xf32>
    %374 = arith.addf %373, %358 : vector<16x40xf32>
    %375 = arith.addf %374, %363 : vector<16x40xf32>
    %376 = arith.addf %375, %368 : vector<16x40xf32>
    %377 = arith.addf %123, %376 : vector<16x40xf32>
    %378 = vector.extract_strided_slice %377 {offsets = [0, 0], sizes = [16, 16], strides = [1, 1]} : vector<16x40xf32> to vector<16x16xf32>
    %c0_197 = arith.constant 0 : index
    %c0_198 = arith.constant 0 : index
    %c0_199 = arith.constant 0 : index
    %379 = vector.load %arg3[%c0_197, %c0_198, %c0_199] : memref<1x16x32xf32, #tpu.memory_space<vmem>>, vector<1x16x16xf32>
    %380 = vector.shape_cast %379 : vector<1x16x16xf32> to vector<16x16xf32>
    %381 = vector.shape_cast %378 : vector<16x16xf32> to vector<1x16x16xf32>
    tpu.vector_store %arg3[%c0_197, %c0_198, %c0_199], %381 {strides = array<i32>} : memref<1x16x32xf32, #tpu.memory_space<vmem>>, vector<1x16x16xf32>,
    %382 = vector.extract_strided_slice %377 {offsets = [0, 20], sizes = [16, 16], strides = [1, 1]} : vector<16x40xf32> to vector<16x16xf32>
    %c0_200 = arith.constant 0 : index
    %c0_201 = arith.constant 0 : index
    %c16_202 = arith.constant 16 : index
    %383 = vector.load %arg3[%c0_200, %c0_201, %c16_202] : memref<1x16x32xf32, #tpu.memory_space<vmem>>, vector<1x16x16xf32>
    %384 = vector.shape_cast %383 : vector<1x16x16xf32> to vector<16x16xf32>
    %385 = vector.shape_cast %382 : vector<16x16xf32> to vector<1x16x16xf32>
    tpu.vector_store %arg3[%c0_200, %c0_201, %c16_202], %385 {strides = array<i32>} : memref<1x16x32xf32, #tpu.memory_space<vmem>>, vector<1x16x16xf32>,
    return
  }
  func.func @transform_0(%arg0: i32) -> i32 {
    %c0_i32 = arith.constant 0 : i32
    %c0_i32_0 = arith.constant 0 : i32
    return %c0_i32 : i32
  }
  func.func @transform_1(%arg0: i32) -> (i32, i32, i32) {
    %c0_i32 = arith.constant 0 : i32
    %c0_i32_0 = arith.constant 0 : i32
    %c0_i32_1 = arith.constant 0 : i32
    return %arg0, %c0_i32, %c0_i32_0 : i32, i32, i32
  }
  func.func @transform_2(%arg0: i32) -> (i32, i32, i32) {
    %c0_i32 = arith.constant 0 : i32
    %c0_i32_0 = arith.constant 0 : i32
    %c0_i32_1 = arith.constant 0 : i32
    return %arg0, %c0_i32, %c0_i32_0 : i32, i32, i32
  }
}

</mosaic_0001>

<bundles_post_ra>
// kernel: tpu_custom_call.1
= control target key start
LH: loop header
LB: loop body
LE: loop exit
PB: predicated region body
PF: predicated region fallthrough
CT: control target
= control target key end

     0   :  { %7 = vsyncpa [#allocation7], 0  ;;  %s1727_s0 = inlined_call_operand.hbm [shape: f32[34], index: 0, kind: input, shape index: {}]   ;;  %s1728_s1 = inlined_call_operand.hbm [shape: f32[2,16,16], index: 1, kind: input, shape index: {}]   ;;  %s1729_s2 = inlined_call_operand.hbm [shape: f32[1,16,32], index: 2, kind: output, shape index: {}]  }
   0x1   :  { %8 = vsyncpa [#allocation5], 0 }
   0x2   :  { %9 = vsyncpa [#allocation6], 0  ;;  %s1179_s9 = smov [#allocation4]   ;;  %s1180_s12 = smov [#allocation8]  }
   0x3   :  { %17 = dma.hbm_to_smem %s1727_s0, 16, %s1179_s9, [#allocation7]  }
   0x4   :  { %s23_s13 = sshll.u32 %s1180_s12, 4  ;;  %s24_s13 = int_to_ptr.vmem [resolvable:$true] %s23_s13 }
   0x5   :  { %s1141_s14 = scalar_lea.vmem %s24_s13, 512  ;;  %p1146_p1 = scmp.lt.s32.totalorder %s24_s13, %s24_s13 }
   0x6   :  { %p1142_p0 = scmp.ne.s32.totalorder %s24_s13, %s1141_s14  ;;  %p1147_p2 = scmp.lt.s32.totalorder %s1141_s14, %s1141_s14 }
   0x8   :  { %p1148_p3 = por %p1147_p2, %p1146_p1 }
   0xa   :  { %p1149_p4 = pnand %p1148_p3, %p1142_p0 }
   0xc   :  { %1152 = shalt.err (!%p1149_p4)
}
   0xd   :  { %s1181_s15 = smov 128   ;;  %s1182_s16 = smov 8  }
   0xe   :  { %29 = dma.hbm_to_vmem [thread:$0]  %s1728_s1, 512, %s24_s13, [#allocation5], %s1181_s15, %s1181_s15, %s1182_s16  }
   0xf   :  { %1173 = dma.done.wait [#allocation7], 16  }
  0x10   :  { %1174 = vsyncadd [#allocation7], 4294967280 }
  0x11   :  { %1175 = dma.done.wait [#allocation5], 512  }
  0x12   :  { %1176 = vsyncadd [#allocation5], 4294966784 }
  0x13   :  { %36 = sfence }
  0x14   :  { %v45_v0 = vld [vmem:[#allocation8] sm:$0xff]  ;;  %v59_v1 = vld [vmem:[#allocation8 + $0x10] sm:$0xff]  ;;  %s1183_s0 = smov 2   ;;  %s1184_s19 = smov 22   ;;  %vm37_vm0 = vcmask 359424   ;;  %vm40_vm1 = vcmask 355328  }
  0x15   :  { %49 = vrot.lane.b32.xlu0 %v45_v0, %s1183_s0  ;;  %63 = vrot.lane.b32.xlu1 %v59_v1, %s1184_s19  ;;  %v46_v2 = vld [vmem:[#allocation8 + $0x8] sm:$0xff]  ;;  %v60_v3 = vld [vmem:[#allocation8 + $0x18] sm:$0xff]  ;;  %v1185_v4 = vmov 0.0   ;;  %vm55_vm2 = vcmask 146448   ;;  %vm69_vm3 = vcmask 310448   ;;  %s1046_s1 = sld [smem:[#allocation4 + $0x5]] }
  0x16   :  { %38 = vst.msk [vmem:[#allocation2] sm:$0xff] %vm37_vm0, %v1185_v4  ;;  %39 = vst.msk [vmem:[#allocation2 + $0x8] sm:$0xff] %vm37_vm0, %v1185_v4  ;;  %s1047_s20 = sld [smem:[#allocation4 + $0x6]]  ;;  %s1186_s23 = smov 127   ;;  %vm225_vm8 = vcmask 343056   ;;  %vm1012_vm9 = vcmask 130048  }
  0x17   :  { %42 = vst.msk [vmem:[#allocation3] sm:$0xff] %vm37_vm0, %v1185_v4  ;;  %43 = vst.msk [vmem:[#allocation3 + $0x8] sm:$0xff] %vm37_vm0, %v1185_v4  ;;  %s1045_s21 = sld [smem:[#allocation4 + $0x4]]  ;;  %s1187_s27 = smov 126   ;;  %vm1021_vm10 = vcmask 261248  }
  0x18   :  { %41 = vst.msk [vmem:[#allocation2 + $0x10] sm:$0xf] %vm40_vm1, %v1185_v4  ;;  %44 = vst.msk [vmem:[#allocation3 + $0x10] sm:$0xf] %vm40_vm1, %v1185_v4  ;;  %s1049_s22 = sld [smem:[#allocation4 + $0x8]]  ;;  %s1188_s29 = smov 1  }
  0x19   :  { %51 = vrot.lane.b32.xlu0 %v46_v2, %s1183_s0  ;;  %65 = vrot.lane.b32.xlu1 %v60_v3, %s1184_s19  ;;  %s1063_s24 = sld [smem:[#allocation4 + $0xe]]  ;;  %s1189_s4 = smov 125  }
  0x1a   :  { %s1064_s25 = sld [smem:[#allocation4 + $0xf]]  ;;  %s1190_s10 = smov 3  }
  0x1b   :  { %v1220_v9 = vstv %s1046_s1  ;;  %s1067_s26 = sld [smem:[#allocation4 + $0x12]] }
  0x1c   :  { %v1226_v12 = vstv %s1047_s20  ;;  %s1048_s28 = sld [smem:[#allocation4 + $0x7]]  ;;  %s1191_s20 = smov 124  }
  0x1d   :  { %v112_v18 = vstv %s1045_s21  ;;  %s1065_s30 = sld [smem:[#allocation4 + $0x10]] }
  0x1e   :  { %v170_v21 = vstv %s1049_s22  ;;  %s1068_s3 = sld [smem:[#allocation4 + $0x13]] }
  0x1f   :  { %v1250_v25 = vstv %s1063_s24  ;;  %s1071_s5 = sld [smem:[#allocation4 + $0x16]] }
  0x20   :  { %v1259_v29 = vstv %s1064_s25  ;;  %s1069_s6 = sld [smem:[#allocation4 + $0x14]] }
  0x21   :  { %v1267_v32 = vstv %s1067_s26  ;;  %s1072_s7 = sld [smem:[#allocation4 + $0x17]] }
  0x22   :  { %v156_v35 = vstv %s1048_s28  ;;  %s1075_s8 = sld [smem:[#allocation4 + $0x1a]] }
  0x23   :  { %v1280_v38 = vstv %s1065_s30  ;;  %s1073_s9 = sld [smem:[#allocation4 + $0x18]] }
  0x24   :  { %v1287_v41 = vstv %s1068_s3  ;;  %s1042_s11 = sld [smem:[#allocation4 + $0x1]] }
  0x25   :  { %v1295_v44 = vstv %s1071_s5  ;;  %s1043_s12 = sld [smem:[#allocation4 + $0x2]] }
  0x26   :  { %v1303_v47 = vstv %s1069_s6  ;;  %s1076_s13 = sld [smem:[#allocation4 + $0x1b]] }
  0x27   :  { %v1311_v50 = vstv %s1072_s7  ;;  %s1077_s14 = sld [smem:[#allocation4 + $0x1c]] }
  0x28   :  { %v1319_v53 = vstv %s1075_s8  ;;  %s1062_s17 = sld [smem:[#allocation4 + $0xd]] }
  0x29   :  { %v1327_v56 = vstv %s1073_s9  ;;  %s1066_s18 = sld [smem:[#allocation4 + $0x11]] }
  0x2a   :  { %v1340_v60 = vstv %s1042_s11  ;;  %s1070_s19 = sld [smem:[#allocation4 + $0x15]] }
  0x2b   :  { %1738 = vst [vmem:[#allocation13_spill] sm:$0xff] %v1340_v60  ;;  %v1344_v63 = vstv %s1043_s12  ;;  %s1074_s1 = sld [smem:[#allocation4 + $0x19]] }
  0x2c   :  { %1739 = vst [vmem:[#allocation14_spill] sm:$0xff] %v1344_v63  ;;  %s1082_s21 = sld [smem:[#allocation4 + $0x21]] }
  0x2d   :  { %s1061_s22 = sld [smem:[#allocation4 + $0xc]] }
  0x2e   :  { %s1060_s24 = sld [smem:[#allocation4 + $0xb]] }
  0x2f   :  { %s1059_s25 = sld [smem:[#allocation4 + $0xa]] }
  0x30   :  { %s1079_s26 = sld [smem:[#allocation4 + $0x1e]] }
  0x31   :  { %s91_s28 = sld [smem:[#allocation4]] }
  0x32   :  { %s1044_s30 = sld [smem:[#allocation4 + $0x3]] }
  0x33   :  { %s1080_s3 = sld [smem:[#allocation4 + $0x1f]] }
  0x34   :  { %s1081_s5 = sld [smem:[#allocation4 + $0x20]] }
  0x35   :  { %s1058_s6 = sld [smem:[#allocation4 + $0x9]] }
  0x36   :  { %s1078_s7 = sld [smem:[#allocation4 + $0x1d]] }
  0x37   :  { %s1057_s8 = sld [smem:[#allocation4 + $0x8]] }
  0x38   :  { %s1056_s9 = sld [smem:[#allocation4 + $0x7]] }
  0x87   :  { %v50_v5 = vpop.permute.xlu0 %49  ;;  %v64_v6 = vpop.permute.xlu1 %63 }
  0x88   :  { %56 = vst.msk [vmem:[#allocation2 + $0x2] sm:$0xff] %vm55_vm2, %v50_v5 }
  0x89   :  { %70 = vst.msk [vmem:[#allocation2 + $0x2] sm:$0xff] %vm69_vm3, %v64_v6 }
  0x8b   :  { %v52_v7 = vpop.permute.xlu0 %51  ;;  %v66_v8 = vpop.permute.xlu1 %65 }
  0x8c   :  { %57 = vst.msk [vmem:[#allocation2 + $0xa] sm:$0xff] %vm55_vm2, %v52_v7  ;;  %v1351_v7 = vstv %s1076_s13 }
  0x8d   :  { %71 = vst.msk [vmem:[#allocation2 + $0xa] sm:$0xff] %vm69_vm3, %v66_v8 }
  0x90   :  { %v1222_v10 = vld [vmem:[#allocation2 + $0x2] sm:$0xff] }
  0x91   :  { %v127_v11 = vmul.f32 %v1220_v9, %v1222_v10  ;;  %v113_v20 = vmul.f32 %v112_v18, %v1222_v10  ;;  %v1248_v24 = vld [vmem:[#allocation2 + $0x1] sm:$0xff]  ;;  %v452_v43 = vmul.f32 %v1287_v41, %v1222_v10  ;;  %v494_v46 = vmul.f32 %v1295_v44, %v1222_v10 }
  0x92   :  { %v380_v27 = vmul.f32 %v1250_v25, %v1248_v24  ;;  %v394_v31 = vmul.f32 %v1259_v29, %v1248_v24  ;;  %v436_v34 = vmul.f32 %v1267_v32, %v1248_v24  ;;  %v408_v40 = vmul.f32 %v1280_v38, %v1248_v24 }
  0x93   :  { %131 = vrot.lane.b32.xlu0 %v127_v11, %s1186_s23  ;;  %v466_v49 = vmul.f32 %v1303_v47, %v1222_v10  ;;  %v508_v52 = vmul.f32 %v1311_v50, %v1222_v10  ;;  %v99_v61 = vmul.f32 %v1248_v24, %v1340_v60  ;;  %v103_v2 = vmul.f32 %v1248_v24, %v1344_v63 }
  0x94   :  { %v1229_v13 = vld [vmem:[#allocation2 + $0xa] sm:$0xff] }
  0x95   :  { %v1231_v14 = vld [vmem:[#allocation2 + $0x3] sm:$0xff]  ;;  %v128_v15 = vmul.f32 %v1220_v9, %v1229_v13  ;;  %v1237_v17 = vld [vmem:[#allocation2 + $0xb] sm:$0xff]  ;;  %v114_v22 = vmul.f32 %v112_v18, %v1229_v13  ;;  %v453_v45 = vmul.f32 %v1287_v41, %v1229_v13  ;;  %v495_v48 = vmul.f32 %v1295_v44, %v1229_v13 }
  0x96   :  { %v143_v16 = vmul.f32 %v1226_v12, %v1231_v14  ;;  %v144_v19 = vmul.f32 %v1226_v12, %v1237_v17  ;;  %v171_v23 = vmul.f32 %v170_v21, %v1231_v14  ;;  %v172_v26 = vmul.f32 %v170_v21, %v1237_v17  ;;  %v1257_v28 = vld [vmem:[#allocation2 + $0x9] sm:$0xff] }
  0x97   :  { %133 = vrot.lane.b32.xlu1 %v128_v15, %s1186_s23  ;;  %v381_v30 = vmul.f32 %v1250_v25, %v1257_v28  ;;  %v395_v33 = vmul.f32 %v1259_v29, %v1257_v28  ;;  %v437_v36 = vmul.f32 %v1267_v32, %v1257_v28  ;;  %v157_v37 = vmul.f32 %v156_v35, %v1231_v14 }
  0x98   :  { %147 = vrot.lane.b32.xlu0 %v143_v16, %s1183_s0  ;;  %v158_v39 = vmul.f32 %v156_v35, %v1237_v17  ;;  %v409_v42 = vmul.f32 %v1280_v38, %v1257_v28  ;;  %v467_v51 = vmul.f32 %v1303_v47, %v1229_v13  ;;  %v509_v54 = vmul.f32 %v1311_v50, %v1229_v13  ;;  %v1385_v35 = vld [vmem:[#allocation2 + $0x8] sm:$0xff] }
  0x99   :  { %v552_v55 = vmul.f32 %v1319_v53, %v1231_v14  ;;  %v553_v57 = vmul.f32 %v1319_v53, %v1237_v17  ;;  %v524_v58 = vmul.f32 %v1327_v56, %v1231_v14  ;;  %v525_v59 = vmul.f32 %v1327_v56, %v1237_v17 }
  0x9a   :  { %v100_v1 = vmul.f32 %v1257_v28, %v1340_v60  ;;  %v104_v8 = vmul.f32 %v1257_v28, %v1344_v63  ;;  %v566_v18 = vmul.f32 %v1351_v7, %v1231_v14 }
  0x9b   :  { %149 = vrot.lane.b32.xlu1 %v144_v19, %s1183_s0  ;;  %v1361_v19 = vstv %s1077_s14 }
  0x9c   :  { %117 = vrot.lane.b32.xlu0 %v113_v20, %s1186_s23 }
  0x9f   :  { %119 = vrot.lane.b32.xlu1 %v114_v22, %s1186_s23  ;;  %v567_v22 = vmul.f32 %v1351_v7, %v1237_v17 }
  0xa0   :  { %175 = vrot.lane.b32.xlu0 %v171_v23, %s1187_s27  ;;  %v580_v23 = vmul.f32 %v1361_v19, %v1231_v14 }
  0xa3   :  { %177 = vrot.lane.b32.xlu1 %v172_v26, %s1187_s27  ;;  %v1373_v26 = vld [vmem:[#allocation2] sm:$0xff] }
  0xa4   :  { %384 = vrot.lane.b32.xlu0 %v380_v27, %s1188_s29  ;;  %v1375_v27 = vstv %s1062_s17 }
  0xa7   :  { %386 = vrot.lane.b32.xlu1 %v381_v30, %s1188_s29 }
  0xa8   :  { %398 = vrot.lane.b32.xlu0 %v394_v31, %s1188_s29 }
  0xab   :  { %400 = vrot.lane.b32.xlu1 %v395_v33, %s1188_s29  ;;  %v581_v33 = vmul.f32 %v1361_v19, %v1237_v17 }
  0xac   :  { %440 = vrot.lane.b32.xlu0 %v436_v34, %s1189_s4  ;;  %v364_v34 = vmul.f32 %v1375_v27, %v1373_v26 }
  0xaf   :  { %442 = vrot.lane.b32.xlu1 %v437_v36, %s1189_s4  ;;  %v1387_v36 = vstv %s1066_s18 }
  0xb0   :  { %161 = vrot.lane.b32.xlu0 %v157_v37, %s1186_s23 }
  0xb3   :  { %163 = vrot.lane.b32.xlu1 %v158_v39, %s1186_s23 }
  0xb4   :  { %412 = vrot.lane.b32.xlu0 %v408_v40, %s1188_s29  ;;  %v365_v40 = vmul.f32 %v1375_v27, %v1385_v35 }
  0xb7   :  { %414 = vrot.lane.b32.xlu1 %v409_v42, %s1188_s29  ;;  %v422_v42 = vmul.f32 %v1387_v36, %v1248_v24 }
  0xb8   :  { %456 = vrot.lane.b32.xlu0 %v452_v43, %s1183_s0  ;;  %v1397_v43 = vstv %s1070_s19 }
  0xbb   :  { %458 = vrot.lane.b32.xlu1 %v453_v45, %s1183_s0 }
  0xbc   :  { %498 = vrot.lane.b32.xlu0 %v494_v46, %s1187_s27 }
  0xbf   :  { %500 = vrot.lane.b32.xlu1 %v495_v48, %s1187_s27  ;;  %v423_v48 = vmul.f32 %v1387_v36, %v1257_v28 }
  0xc0   :  { %470 = vrot.lane.b32.xlu0 %v466_v49, %s1183_s0  ;;  %v480_v49 = vmul.f32 %v1397_v43, %v1222_v10 }
  0xc3   :  { %472 = vrot.lane.b32.xlu1 %v467_v51, %s1183_s0  ;;  %v1405_v51 = vstv %s1074_s1 }
  0xc4   :  { %512 = vrot.lane.b32.xlu0 %v508_v52, %s1187_s27 }
  0xc7   :  { %514 = vrot.lane.b32.xlu1 %v509_v54, %s1187_s27 }
  0xc8   :  { %556 = vrot.lane.b32.xlu0 %v552_v55, %s1186_s23  ;;  %v481_v55 = vmul.f32 %v1397_v43, %v1229_v13 }
  0xcb   :  { %558 = vrot.lane.b32.xlu1 %v553_v57, %s1186_s23  ;;  %v538_v57 = vmul.f32 %v1405_v51, %v1231_v14  ;;  %v1427_v14 = vld [vmem:[#allocation2 + $0xc] sm:$0xff] }
  0xcc   :  { %528 = vrot.lane.b32.xlu0 %v524_v58, %s1190_s10  ;;  %v1415_v58 = vld [vmem:[#allocation2 + $0x4] sm:$0xff] }
  0xcf   :  { %530 = vrot.lane.b32.xlu1 %v525_v59, %s1190_s10  ;;  %v1417_v59 = vstv %s1082_s21 }
 0x105   :  { %v132_v62 = vpop.permute.xlu0 %131 }
 0x106   :  { %v137_v0 = vadd.f32 %v132_v62, %v99_v61 }
 0x108   :  { %185 = vrot.lane.b32.xlu0 %v137_v0, %s1186_s23  ;;  %v539_v0 = vmul.f32 %v1405_v51, %v1237_v17  ;;  %v1436_v17 = vstv %s1060_s24 }
 0x109   :  { %v134_v3 = vpop.permute.xlu1 %133  ;;  %1741 = vst [vmem:[#allocation16_spill] sm:$0xff] %v1436_v17 }
 0x10a   :  { %v148_v4 = vpop.permute.xlu0 %147  ;;  %v138_v5 = vadd.f32 %v134_v3, %v100_v1  ;;  %v620_v1 = vmul.f32 %v1417_v59, %v1415_v58 }
 0x10b   :  { %v153_v6 = vadd.f32 %v148_v4, %v103_v2  ;;  %v621_v4 = vmul.f32 %v1417_v59, %v1427_v14 }
 0x10c   :  { %187 = vrot.lane.b32.xlu1 %v138_v5, %s1186_s23  ;;  %v1433_v5 = vstv %s1061_s22 }
 0x10d   :  { %195 = vrot.lane.b32.xlu0 %v153_v6, %s1187_s27  ;;  %v150_v11 = vpop.permute.xlu1 %149  ;;  %1740 = vst [vmem:[#allocation15_spill] sm:$0xff] %v1433_v5 }
 0x10e   :  { %v1357_v15 = vpop.permute.xlu0 %117  ;;  %v154_v16 = vadd.f32 %v150_v11, %v104_v8  ;;  %v360_v11 = vmul.f32 %v1433_v5, %v1373_v26 }
 0x110   :  { %197 = vrot.lane.b32.xlu1 %v154_v16, %s1187_s27  ;;  %v1440_v16 = vstv %s1059_s25 }
 0x111   :  { %570 = vrot.lane.b32.xlu0 %v566_v18, %s1186_s23  ;;  %v1365_v20 = vpop.permute.xlu1 %119  ;;  %v356_v18 = vmul.f32 %v1436_v17, %v1373_v26 }
 0x112   :  { %v1367_v21 = vpop.permute.xlu0 %175 }
 0x114   :  { %572 = vrot.lane.b32.xlu1 %v567_v22, %s1186_s23 }
 0x115   :  { %584 = vrot.lane.b32.xlu0 %v580_v23, %s1186_s23  ;;  %v1379_v30 = vpop.permute.xlu1 %177 }
 0x116   :  { %v385_v31 = vpop.permute.xlu0 %384 }
 0x118   :  { %586 = vrot.lane.b32.xlu1 %v581_v33, %s1186_s23 }
 0x119   :  { %368 = vrot.lane.b32.xlu0 %v364_v34, %s1191_s20  ;;  %v1391_v37 = vpop.permute.xlu1 %386  ;;  %v352_v34 = vmul.f32 %v1440_v16, %v1373_v26 }
 0x11a   :  { %v399_v39 = vpop.permute.xlu0 %398 }
 0x11c   :  { %370 = vrot.lane.b32.xlu1 %v365_v40, %s1191_s20  ;;  %v404_v40 = vadd.f32 %v399_v39, %v356_v18  ;;  %v1456_v18 = vstv %s1079_s26 }
 0x11d   :  { %426 = vrot.lane.b32.xlu0 %v422_v42, %s1189_s4  ;;  %v401_v45 = vpop.permute.xlu1 %400  ;;  %v361_v42 = vmul.f32 %v1433_v5, %v1385_v35 }
 0x11e   :  { %v441_v46 = vpop.permute.xlu0 %440 }
 0x120   :  { %428 = vrot.lane.b32.xlu1 %v423_v48, %s1189_s4 }
 0x121   :  { %484 = vrot.lane.b32.xlu0 %v480_v49, %s1187_s27  ;;  %v443_v52 = vpop.permute.xlu1 %442  ;;  %v390_v49 = vadd.f32 %v385_v31, %v352_v34 }
 0x122   :  { %v1409_v54 = vpop.permute.xlu0 %161 }
 0x123   :  { %v446_v63 = vadd.f32 %v441_v46, %v390_v49  ;;  %v603_v49 = vmul.f32 %v1456_v18, %v1427_v14 }
 0x124   :  { %486 = vrot.lane.b32.xlu1 %v481_v55, %s1187_s27  ;;  %v357_v55 = vmul.f32 %v1436_v17, %v1385_v35 }
 0x125   :  { %542 = vrot.lane.b32.xlu0 %v538_v57, %s1186_s23  ;;  %v1421_v61 = vpop.permute.xlu1 %163 }
 0x126   :  { %v413_v62 = vpop.permute.xlu0 %412 }
 0x127   :  { %v418_v22 = vadd.f32 %v413_v62, %v360_v11  ;;  %v353_v62 = vmul.f32 %v1440_v16, %v1385_v35  ;;  %v405_v11 = vadd.f32 %v401_v45, %v357_v55 }
 0x128   :  { %544 = vrot.lane.b32.xlu1 %v539_v0, %s1186_s23 }
 0x129   :  { %624 = vrot.lane.b32.xlu0 %v620_v1, %s1191_s20  ;;  %v415_v2 = vpop.permute.xlu1 %414 }
 0x12a   :  { %v457_v3 = vpop.permute.xlu0 %456  ;;  %v419_v57 = vadd.f32 %v415_v2, %v361_v42 }
 0x12b   :  { %v462_v0 = vadd.f32 %v457_v3, %v404_v40  ;;  %v602_v40 = vmul.f32 %v1456_v18, %v1415_v58 }
 0x12c   :  { %626 = vrot.lane.b32.xlu1 %v621_v4, %s1191_s20 }
 0x12d   :  { %v459_v6 = vpop.permute.xlu1 %458 }
 0x12e   :  { %v499_v8 = vpop.permute.xlu0 %498  ;;  %v463_v31 = vadd.f32 %v459_v6, %v405_v11 }
 0x131   :  { %v501_v23 = vpop.permute.xlu1 %500 }
 0x132   :  { %v471_v33 = vpop.permute.xlu0 %470 }
 0x133   :  { %v1448_v48 = vadd.f32 %v471_v33, %v418_v22  ;;  %v391_v22 = vadd.f32 %v1391_v37, %v353_v62  ;;  %v504_v33 = vadd.f32 %v499_v8, %v446_v63  ;;  %v94_v63 = vstv %s91_s28 }
 0x134   :  { %v95_v6 = vmul.f32 %v1248_v24, %v94_v63  ;;  %v1467_v8 = vstv %s1044_s30 }
 0x135   :  { %v473_v1 = vpop.permute.xlu1 %472  ;;  %v447_v2 = vadd.f32 %v443_v52, %v391_v22 }
 0x136   :  { %v513_v4 = vpop.permute.xlu0 %512  ;;  %v1454_v60 = vadd.f32 %v473_v1, %v419_v57  ;;  %v109_v1 = vmul.f32 %v1467_v8, %v1222_v10 }
 0x137   :  { %v518_v39 = vadd.f32 %v513_v4, %v462_v0  ;;  %v505_v17 = vadd.f32 %v501_v23, %v447_v2 }
 0x139   :  { %v515_v34 = vpop.permute.xlu1 %514 }
 0x13a   :  { %v557_v5 = vpop.permute.xlu0 %556  ;;  %v519_v3 = vadd.f32 %v515_v34, %v463_v31 }
 0x13b   :  { %v562_v42 = vadd.f32 %v557_v5, %v504_v33  ;;  %v123_v5 = vadd.f32 %v1357_v15, %v95_v6  ;;  %v167_v15 = vadd.f32 %v1409_v54, %v109_v1  ;;  %v1476_v33 = vstv %s1080_s3 }
 0x13d   :  { %v604_v45 = vadd.f32 %v602_v40, %v562_v42  ;;  %v559_v46 = vpop.permute.xlu1 %558  ;;  %v181_v0 = vadd.f32 %v1367_v21, %v123_v5  ;;  %v608_v42 = vmul.f32 %v1476_v33, %v1415_v58 }
 0x13e   :  { %v563_v55 = vadd.f32 %v559_v46, %v505_v17  ;;  %v529_v52 = vpop.permute.xlu0 %528  ;;  %v96_v17 = vmul.f32 %v1257_v28, %v94_v63  ;;  %v110_v28 = vmul.f32 %v1467_v8, %v1229_v13 }
 0x13f   :  { %634 = vrot.lane.b32.xlu0 %v604_v45, %s1186_s23  ;;  %v534_v54 = vadd.f32 %v529_v52, %v1448_v48 }
 0x140   :  { %v605_v37 = vadd.f32 %v603_v49, %v563_v55  ;;  %v124_v62 = vadd.f32 %v1365_v20, %v96_v17  ;;  %v168_v40 = vadd.f32 %v1421_v61, %v110_v28 }
 0x141   :  { %v531_v23 = vpop.permute.xlu1 %530 }
 0x142   :  { %636 = vrot.lane.b32.xlu1 %v605_v37, %s1186_s23  ;;  %v182_v22 = vadd.f32 %v1379_v30, %v124_v62  ;;  %v1483_v30 = vstv %s1081_s5  ;;  %v609_v37 = vmul.f32 %v1476_v33, %v1427_v14 }
 0x143   :  { %v614_v61 = vmul.f32 %v1483_v30, %v1415_v58 }
 0x17a   :  { %v186_v57 = vpop.permute.xlu0 %185 }
 0x17b   :  { %v191_v4 = vadd.f32 %v186_v57, %v181_v0  ;;  %v615_v0 = vmul.f32 %v1483_v30, %v1427_v14 }
 0x17e   :  { %v188_v11 = vpop.permute.xlu1 %187 }
 0x17f   :  { %v196_v24 = vpop.permute.xlu0 %195  ;;  %v192_v21 = vadd.f32 %v188_v11, %v182_v22 }
 0x180   :  { %v201_v31 = vadd.f32 %v196_v24, %v191_v4 }
 0x182   :  { %v203_v34 = vadd.f32 %v201_v31, %v167_v15  ;;  %v198_v2 = vpop.permute.xlu1 %197 }
 0x183   :  { %v571_v20 = vpop.permute.xlu0 %570  ;;  %v202_v10 = vadd.f32 %v198_v2, %v192_v21  ;;  %v1505_v21 = vstv %s1078_s7 }
 0x184   :  { %v576_v45 = vadd.f32 %v571_v20, %v518_v39  ;;  %v535_v39 = vadd.f32 %v531_v23, %v1454_v60  ;;  %v205_v5 = vmax.f32 %v203_v34, 0.0 }
 0x185   :  { %v204_v46 = vadd.f32 %v202_v10, %v168_v40 }
 0x186   :  { %v610_v49 = vadd.f32 %v608_v42, %v576_v45  ;;  %v573_v55 = vpop.permute.xlu1 %572  ;;  %v596_v42 = vmul.f32 %v1505_v21, %v1415_v58 }
 0x187   :  { %v585_v13 = vpop.permute.xlu0 %584  ;;  %v577_v63 = vadd.f32 %v573_v55, %v519_v3  ;;  %v1496_v3 = vstv %s1058_s6  ;;  %v206_v1 = vmax.f32 %v204_v46, 0.0 }
 0x188   :  { %v590_v6 = vadd.f32 %v585_v13, %v534_v54  ;;  %644 = vrot.lane.b32.xlu0 %v610_v49, %s1187_s27  ;;  %v348_v23 = vmul.f32 %v1496_v3, %v1373_v26  ;;  %v349_v31 = vmul.f32 %v1496_v3, %v1385_v35  ;;  %v597_v35 = vmul.f32 %v1505_v21, %v1427_v14 }
 0x189   :  { %v611_v57 = vadd.f32 %v609_v37, %v577_v63  ;;  %v72_v13 = vlaneseq }
 0x18a   :  { %v616_v17 = vadd.f32 %v614_v61, %v590_v6  ;;  %v587_v48 = vpop.permute.xlu1 %586 }
 0x18b   :  { %v369_v52 = vpop.permute.xlu0 %368  ;;  %v591_v62 = vadd.f32 %v587_v48, %v535_v39  ;;  %646 = vrot.lane.b32.xlu1 %v611_v57, %s1187_s27  ;;  %v73_v37 = vand.u32 127, %v72_v13 }
 0x18c   :  { %209 = vrot.lane.b32.xlu0 %v205_v5, %s1186_s23  ;;  %v374_v24 = vadd.f32 %v369_v52, %v348_v23 }
 0x18d   :  { %v617_v4 = vadd.f32 %v615_v0, %v591_v62  ;;  %v1511_v63 = vmul.u32.u64.low 3435973837, %v73_v37  ;;  %v1512_v61 = vmul.u32.u64.high 3435973837, %v73_v37, %v1511_v63 }
 0x18e   :  { %v371_v11 = vpop.permute.xlu1 %370 }
 0x18f   :  { %v427_v60 = vpop.permute.xlu0 %426  ;;  %211 = vrot.lane.b32.xlu1 %v206_v1, %s1186_s23  ;;  %v375_v34 = vadd.f32 %v371_v11, %v349_v31  ;;  %v80_v6 = vshrl.u32 %v1512_v61, 4 }
 0x190   :  { %654 = vrot.lane.b32.xlu0 %v616_v17, %s1189_s4  ;;  %v432_v28 = vadd.f32 %v427_v60, %v374_v24 }
 0x191   :  { %v81_v39 = vmul.u32 20, %v80_v6 }
 0x192   :  { %v429_v22 = vpop.permute.xlu1 %428 }
 0x193   :  { %v485_v15 = vpop.permute.xlu0 %484  ;;  %656 = vrot.lane.b32.xlu1 %v617_v4, %s1189_s4  ;;  %v433_v26 = vadd.f32 %v429_v22, %v375_v34  ;;  %v82_v5 = vsub.s32 %v73_v37, %v81_v39 }
 0x194   :  { %v490_v2 = vadd.f32 %v485_v15, %v432_v28 }
 0x195   :  { %vm85_vm4 = vcmp.ne.s32.totalorder %v82_v5, 0  ;;  %vm86_vm5 = vcmp.lt.s32.totalorder %v82_v5, 0  ;;  %v88_v58 = vadd.s32 20, %v82_v5 }
 0x196   :  { %v487_v20 = vpop.permute.xlu1 %486  ;;  %vm87_vm6 = vmand %vm86_vm5, %vm85_vm4 }
 0x197   :  { %v543_v40 = vpop.permute.xlu0 %542  ;;  %v491_v45 = vadd.f32 %v487_v20, %v433_v26  ;;  %v89_v52 = vsel %vm87_vm6, %v88_v58, %v82_v5 }
 0x198   :  { %v548_v10 = vadd.f32 %v543_v40, %v490_v2  ;;  %vm1515_vm7 = vcmp.lt.s32.totalorder %v89_v52, 16 }
 0x19a   :  { %v598_v54 = vadd.f32 %v596_v42, %v548_v10  ;;  %v545_v46 = vpop.permute.xlu1 %544 }
 0x19b   :  { %v549_v49 = vadd.f32 %v545_v46, %v491_v45  ;;  %v625_v57 = vpop.permute.xlu0 %624 }
 0x19c   :  { %v630_v1 = vadd.f32 %v625_v57, %v598_v54 }
 0x19d   :  { %v599_v55 = vadd.f32 %v597_v35, %v549_v49 }
 0x19e   :  { %v627_v17 = vpop.permute.xlu1 %626 }
 0x19f   :  { %v631_v24 = vadd.f32 %v627_v17, %v599_v55 }
 0x1b1   :  { %v635_v48 = vpop.permute.xlu0 %634 }
 0x1b2   :  { %v640_v60 = vadd.f32 %v635_v48, %v630_v1 }
 0x1b4   :  { %v637_v0 = vpop.permute.xlu1 %636 }
 0x1b5   :  { %v641_v28 = vadd.f32 %v637_v0, %v631_v24 }
 0x1fa   :  { %v645_v14 = vpop.permute.xlu0 %644 }
 0x1fb   :  { %v650_v22 = vadd.f32 %v645_v14, %v640_v60 }
 0x1fd   :  { %v647_v4 = vpop.permute.xlu1 %646 }
 0x1fe   :  { %v210_v11 = vpop.permute.xlu0 %209  ;;  %v651_v20 = vadd.f32 %v647_v4, %v641_v28 }
 0x1ff   :  { %v215_v23 = vsel %vm1515_vm7, %v210_v11, 0.0 }
 0x200   :  { %219 = vrot.lane.b32.xlu0 %v215_v23, %s1183_s0 }
 0x201   :  { %v212_v15 = vpop.permute.xlu1 %211 }
 0x202   :  { %v655_v31 = vpop.permute.xlu0 %654  ;;  %v216_v34 = vsel %vm1515_vm7, %v212_v15, 0.0 }
 0x203   :  { %v660_v2 = vadd.f32 %v655_v31, %v650_v22  ;;  %221 = vrot.lane.b32.xlu1 %v216_v34, %s1183_s0 }
 0x205   :  { %v662_v40 = vmax.f32 %v660_v2, 0.0  ;;  %v657_v26 = vpop.permute.xlu1 %656 }
 0x206   :  { %v661_v10 = vadd.f32 %v657_v26, %v651_v20 }
 0x207   :  { %v664_v42 = vsel %vm1515_vm7, %v662_v40, 0.0 }
 0x208   :  { %668 = vrot.lane.b32.xlu0 %v664_v42, %s1183_s0  ;;  %v663_v45 = vmax.f32 %v661_v10, 0.0 }
 0x20a   :  { %v665_v54 = vsel %vm1515_vm7, %v663_v45, 0.0 }
 0x20b   :  { %670 = vrot.lane.b32.xlu1 %v665_v54, %s1183_s0 }
 0x272   :  { %v220_v46 = vpop.permute.xlu0 %219 }
 0x273   :  { %226 = vst.msk [vmem:[#allocation3 + $0x2] sm:$0xff] %vm225_vm8, %v220_v46 }
 0x275   :  { %v222_v49 = vpop.permute.xlu1 %221 }
 0x276   :  { %227 = vst.msk [vmem:[#allocation3 + $0xa] sm:$0xff] %vm225_vm8, %v222_v49 }
 0x27a   :  { %v1531_v35 = vld [vmem:[#allocation3 + $0x1] sm:$0xff]  ;;  %v669_v63 = vpop.permute.xlu0 %668 }
 0x27b   :  { %v1533_v55 = vld [vmem:[#allocation3 + $0x2] sm:$0xff] }
 0x27d   :  { %v1535_v13 = vld [vmem:[#allocation3 + $0x9] sm:$0xff]  ;;  %v671_v6 = vpop.permute.xlu1 %670 }
 0x27e   :  { %v1537_v37 = vld [vmem:[#allocation3 + $0x3] sm:$0xff]  ;;  %v1541_v39 = vld [vmem:[#allocation3 + $0xb] sm:$0xff] }
 0x27f   :  { %v1539_v61 = vld [vmem:[#allocation3 + $0xa] sm:$0xff]  ;;  %674 = vst.msk [vmem:[#allocation3 + $0x2] sm:$0xff] %vm225_vm8, %v669_v63 }
 0x280   :  { %675 = vst.msk [vmem:[#allocation3 + $0xa] sm:$0xff] %vm225_vm8, %v671_v6  ;;  %v265_v20 = vmul.f32 %v1539_v61, %v1220_v9 }
 0x286   :  { %v1543_v5 = vld [vmem:[#allocation3 + $0x1] sm:$0xff] }
 0x287   :  { %v1545_v57 = vld [vmem:[#allocation3 + $0x9] sm:$0xff]  ;;  %v712_v58 = vmul.f32 %v1543_v5, %v1250_v25  ;;  %v726_v48 = vmul.f32 %v1543_v5, %v1259_v29  ;;  %v768_v0 = vmul.f32 %v1543_v5, %v1267_v32  ;;  %v740_v14 = vmul.f32 %v1543_v5, %v1280_v38  ;;  %v1613_v40 = vld [vmem:[#allocation3] sm:$0xff] }
 0x288   :  { %v713_v17 = vmul.f32 %v1545_v57, %v1250_v25  ;;  %v727_v52 = vmul.f32 %v1545_v57, %v1259_v29  ;;  %v769_v25 = vmul.f32 %v1545_v57, %v1267_v32  ;;  %v741_v29 = vmul.f32 %v1545_v57, %v1280_v38  ;;  %v781_v62 = vld [vmem:[#allocation3 + $0x2] sm:$0xff]  ;;  %v782_v1 = vld [vmem:[#allocation3 + $0xa] sm:$0xff] }
 0x289   :  { %716 = vrot.lane.b32.xlu0 %v712_v58, %s1188_s29  ;;  %v784_v4 = vmul.f32 %v781_v62, %v1287_v41  ;;  %v785_v32 = vmul.f32 %v782_v1, %v1287_v41  ;;  %v826_v11 = vmul.f32 %v781_v62, %v1295_v44  ;;  %v827_v60 = vmul.f32 %v782_v1, %v1295_v44  ;;  %v853_v22 = vld [vmem:[#allocation3 + $0x3] sm:$0xff]  ;;  %v854_v44 = vld [vmem:[#allocation3 + $0xb] sm:$0xff] }
 0x28a   :  { %718 = vrot.lane.b32.xlu1 %v713_v17, %s1188_s29  ;;  %v798_v38 = vmul.f32 %v781_v62, %v1303_v47  ;;  %v799_v23 = vmul.f32 %v782_v1, %v1303_v47  ;;  %v840_v41 = vmul.f32 %v781_v62, %v1311_v50  ;;  %v841_v24 = vmul.f32 %v782_v1, %v1311_v50  ;;  %v1616_v26 = vld [vmem:[#allocation3 + $0x8] sm:$0xff] }
 0x28b   :  { %v884_v15 = vmul.f32 %v853_v22, %v1319_v53  ;;  %v885_v31 = vmul.f32 %v854_v44, %v1319_v53  ;;  %v856_v47 = vmul.f32 %v853_v22, %v1327_v56  ;;  %v857_v28 = vmul.f32 %v854_v44, %v1327_v56  ;;  %v1637_v49 = vld [vmem:[#allocation3 + $0x4] sm:$0xff] }
 0x28c   :  { %v898_v50 = vmul.f32 %v853_v22, %v1351_v7  ;;  %v899_v34 = vmul.f32 %v854_v44, %v1351_v7  ;;  %v912_v53 = vmul.f32 %v853_v22, %v1361_v19  ;;  %v913_v2 = vmul.f32 %v854_v44, %v1361_v19 }
 0x28d   :  { %730 = vrot.lane.b32.xlu0 %v726_v48, %s1188_s29  ;;  %v264_v56 = vmul.f32 %v1533_v55, %v1220_v9  ;;  %v280_v7 = vmul.f32 %v1537_v37, %v1226_v12  ;;  %v281_v19 = vmul.f32 %v1541_v39, %v1226_v12  ;;  %v696_v9 = vmul.f32 %v1613_v40, %v1375_v27 }
 0x28e   :  { %732 = vrot.lane.b32.xlu1 %v727_v52, %s1188_s29  ;;  %v697_v10 = vmul.f32 %v1616_v26, %v1375_v27  ;;  %v754_v12 = vmul.f32 %v1543_v5, %v1387_v36  ;;  %v755_v42 = vmul.f32 %v1545_v57, %v1387_v36  ;;  %v812_v45 = vmul.f32 %v781_v62, %v1397_v43  ;;  %v1640_v36 = vld [vmem:[#allocation3 + $0xc] sm:$0xff] }
 0x28f   :  { %v813_v54 = vmul.f32 %v782_v1, %v1397_v43  ;;  %v870_v27 = vmul.f32 %v853_v22, %v1405_v51  ;;  %v871_v46 = vmul.f32 %v854_v44, %v1405_v51  ;;  %v952_v63 = vmul.f32 %v1637_v49, %v1417_v59 }
 0x290   :  { %v953_v43 = vmul.f32 %v1640_v36, %v1417_v59  ;;  %v684_v59 = vmul.f32 %v1613_v40, %v1440_v16 }
 0x291   :  { %772 = vrot.lane.b32.xlu0 %v768_v0, %s1189_s4 }
 0x292   :  { %774 = vrot.lane.b32.xlu1 %v769_v25, %s1189_s4 }
 0x295   :  { %744 = vrot.lane.b32.xlu0 %v740_v14, %s1188_s29 }
 0x296   :  { %746 = vrot.lane.b32.xlu1 %v741_v29, %s1188_s29 }
 0x299   :  { %788 = vrot.lane.b32.xlu0 %v784_v4, %s1183_s0  ;;  %v685_v4 = vmul.f32 %v1616_v26, %v1440_v16 }
 0x29a   :  { %790 = vrot.lane.b32.xlu1 %v785_v32, %s1183_s0 }
 0x29d   :  { %830 = vrot.lane.b32.xlu0 %v826_v11, %s1187_s27 }
 0x29e   :  { %832 = vrot.lane.b32.xlu1 %v827_v60, %s1187_s27 }
 0x2a1   :  { %802 = vrot.lane.b32.xlu0 %v798_v38, %s1183_s0 }
 0x2a2   :  { %804 = vrot.lane.b32.xlu1 %v799_v23, %s1183_s0 }
 0x2a5   :  { %844 = vrot.lane.b32.xlu0 %v840_v41, %s1187_s27 }
 0x2a6   :  { %846 = vrot.lane.b32.xlu1 %v841_v24, %s1187_s27 }
 0x2a9   :  { %888 = vrot.lane.b32.xlu0 %v884_v15, %s1186_s23  ;;  %v1744_v15 = vld [vmem:[#allocation16_spill] sm:$0xff] }
 0x2aa   :  { %890 = vrot.lane.b32.xlu1 %v885_v31, %s1186_s23  ;;  %v688_v31 = vmul.f32 %v1613_v40, %v1744_v15  ;;  %v689_v16 = vmul.f32 %v1616_v26, %v1744_v15 }
 0x2ad   :  { %860 = vrot.lane.b32.xlu0 %v856_v47, %s1190_s10 }
 0x2ae   :  { %862 = vrot.lane.b32.xlu1 %v857_v28, %s1190_s10  ;;  %v934_v28 = vmul.f32 %v1637_v49, %v1456_v18 }
 0x2b1   :  { %902 = vrot.lane.b32.xlu0 %v898_v50, %s1186_s23 }
 0x2b2   :  { %904 = vrot.lane.b32.xlu1 %v899_v34, %s1186_s23  ;;  %v935_v34 = vmul.f32 %v1640_v36, %v1456_v18 }
 0x2b5   :  { %916 = vrot.lane.b32.xlu0 %v912_v53, %s1186_s23 }
 0x2b6   :  { %918 = vrot.lane.b32.xlu1 %v913_v2, %s1186_s23 }
 0x2b9   :  { %268 = vrot.lane.b32.xlu0 %v264_v56, %s1186_s23 }
 0x2ba   :  { %270 = vrot.lane.b32.xlu1 %v265_v20, %s1186_s23 }
 0x2bd   :  { %284 = vrot.lane.b32.xlu0 %v280_v7, %s1183_s0 }
 0x2be   :  { %286 = vrot.lane.b32.xlu1 %v281_v19, %s1183_s0  ;;  %s1053_s0 = sld [smem:[#allocation4 + $0x4]] }
 0x2c1   :  { %700 = vrot.lane.b32.xlu0 %v696_v9, %s1191_s20  ;;  %v1745_v9 = vld [vmem:[#allocation15_spill] sm:$0xff] }
 0x2c2   :  { %702 = vrot.lane.b32.xlu1 %v697_v10, %s1191_s20  ;;  %v692_v10 = vmul.f32 %v1613_v40, %v1745_v9 }
 0x2c5   :  { %758 = vrot.lane.b32.xlu0 %v754_v12, %s1189_s4 }
 0x2c6   :  { %760 = vrot.lane.b32.xlu1 %v755_v42, %s1189_s4 }
 0x2c9   :  { %816 = vrot.lane.b32.xlu0 %v812_v45, %s1187_s27  ;;  %v693_v45 = vmul.f32 %v1616_v26, %v1745_v9  ;;  %v681_v9 = vmul.f32 %v1616_v26, %v1496_v3 }
 0x2ca   :  { %818 = vrot.lane.b32.xlu1 %v813_v54, %s1187_s27 }
 0x2cd   :  { %874 = vrot.lane.b32.xlu0 %v870_v27, %s1186_s23 }
 0x2ce   :  { %876 = vrot.lane.b32.xlu1 %v871_v46, %s1186_s23 }
 0x2d1   :  { %956 = vrot.lane.b32.xlu0 %v952_v63, %s1191_s20 }
 0x2d2   :  { %958 = vrot.lane.b32.xlu1 %v953_v43, %s1191_s20 }
 0x2fb   :  { %v717_v6 = vpop.permute.xlu0 %716 }
 0x2fc   :  { %v719_v51 = vpop.permute.xlu1 %718  ;;  %v722_v32 = vadd.f32 %v717_v6, %v684_v59 }
 0x2fd   :  { %v723_v11 = vadd.f32 %v719_v51, %v685_v4 }
 0x2ff   :  { %v731_v5 = vpop.permute.xlu0 %730 }
 0x300   :  { %v733_v57 = vpop.permute.xlu1 %732  ;;  %v736_v2 = vadd.f32 %v731_v5, %v688_v31  ;;  %v940_v5 = vmul.f32 %v1637_v49, %v1476_v33 }
 0x301   :  { %v737_v20 = vadd.f32 %v733_v57, %v689_v16 }
 0x303   :  { %v773_v58 = vpop.permute.xlu0 %772 }
 0x304   :  { %v775_v17 = vpop.permute.xlu1 %774  ;;  %v778_v38 = vadd.f32 %v773_v58, %v722_v32 }
 0x305   :  { %v779_v41 = vadd.f32 %v775_v17, %v723_v11  ;;  %v941_v17 = vmul.f32 %v1640_v36, %v1476_v33 }
 0x307   :  { %v745_v48 = vpop.permute.xlu0 %744 }
 0x308   :  { %v747_v52 = vpop.permute.xlu1 %746  ;;  %v750_v18 = vadd.f32 %v745_v48, %v692_v10 }
 0x309   :  { %v751_v46 = vadd.f32 %v747_v52, %v693_v45 }
 0x30b   :  { %v789_v0 = vpop.permute.xlu0 %788 }
 0x30c   :  { %v791_v25 = vpop.permute.xlu1 %790  ;;  %v794_v12 = vadd.f32 %v789_v0, %v736_v2 }
 0x30d   :  { %v795_v54 = vadd.f32 %v791_v25, %v737_v20  ;;  %v293_v20 = vstv %s1056_s9 }
 0x30f   :  { %v831_v14 = vpop.permute.xlu0 %830 }
 0x310   :  { %v833_v29 = vpop.permute.xlu1 %832  ;;  %v836_v24 = vadd.f32 %v831_v14, %v778_v38  ;;  %v249_v38 = vstv %s1053_s0 }
 0x311   :  { %v837_v22 = vadd.f32 %v833_v29, %v779_v41  ;;  %v250_v41 = vmul.f32 %v249_v38, %v1533_v55 }
 0x313   :  { %v803_v62 = vpop.permute.xlu0 %802 }
 0x314   :  { %v805_v1 = vpop.permute.xlu1 %804  ;;  %v808_v6 = vadd.f32 %v803_v62, %v750_v18  ;;  %v946_v62 = vmul.f32 %v1637_v49, %v1483_v30  ;;  %v1747_v18 = vld [vmem:[#allocation14_spill] sm:$0xff] }
 0x315   :  { %v809_v58 = vadd.f32 %v805_v1, %v751_v46  ;;  %v947_v1 = vmul.f32 %v1640_v36, %v1483_v30 }
 0x317   :  { %v845_v60 = vpop.permute.xlu0 %844 }
 0x318   :  { %v847_v23 = vpop.permute.xlu1 %846  ;;  %v850_v27 = vadd.f32 %v845_v60, %v794_v12  ;;  %v294_v12 = vmul.f32 %v293_v20, %v1537_v37 }
 0x319   :  { %v851_v63 = vadd.f32 %v847_v23, %v795_v54  ;;  %v295_v54 = vmul.f32 %v293_v20, %v1541_v39  ;;  %v246_v20 = vmul.f32 %v1533_v55, %v1467_v8 }
 0x31b   :  { %v889_v44 = vpop.permute.xlu0 %888 }
 0x31c   :  { %v891_v47 = vpop.permute.xlu1 %890  ;;  %v894_v50 = vadd.f32 %v889_v44, %v836_v24  ;;  %v307_v44 = vstv %s1057_s8 }
 0x31d   :  { %v895_v53 = vadd.f32 %v891_v47, %v837_v22  ;;  %v251_v22 = vmul.f32 %v249_v38, %v1539_v61  ;;  %v308_v15 = vmul.f32 %v307_v44, %v1537_v37  ;;  %v309_v47 = vmul.f32 %v307_v44, %v1541_v39 }
 0x31e   :  { %v936_v56 = vadd.f32 %v934_v28, %v894_v50  ;;  %v1746_v28 = vld [vmem:[#allocation13_spill] sm:$0xff] }
 0x31f   :  { %v937_v7 = vadd.f32 %v935_v34, %v895_v53  ;;  %v861_v19 = vpop.permute.xlu0 %860  ;;  %v236_v50 = vmul.f32 %v1531_v35, %v1746_v28  ;;  %v237_v34 = vmul.f32 %v1535_v13, %v1746_v28 }
 0x320   :  { %v863_v42 = vpop.permute.xlu1 %862  ;;  %966 = vrot.lane.b32.xlu0 %v936_v56, %s1186_s23  ;;  %v866_v25 = vadd.f32 %v861_v19, %v808_v6 }
 0x321   :  { %968 = vrot.lane.b32.xlu1 %v937_v7, %s1186_s23  ;;  %v867_v29 = vadd.f32 %v863_v42, %v809_v58  ;;  %v680_v7 = vmul.f32 %v1613_v40, %v1496_v3 }
 0x323   :  { %v903_v43 = vpop.permute.xlu0 %902 }
 0x324   :  { %v905_v51 = vpop.permute.xlu1 %904  ;;  %v908_v57 = vadd.f32 %v903_v43, %v850_v27  ;;  %v240_v27 = vmul.f32 %v1531_v35, %v1747_v18 }
 0x325   :  { %v909_v0 = vadd.f32 %v905_v51, %v851_v63  ;;  %v241_v63 = vmul.f32 %v1535_v13, %v1747_v18 }
 0x326   :  { %v942_v14 = vadd.f32 %v940_v5, %v908_v57  ;;  %v928_v57 = vmul.f32 %v1637_v49, %v1505_v21 }
 0x327   :  { %v943_v48 = vadd.f32 %v941_v17, %v909_v0  ;;  %v917_v59 = vpop.permute.xlu0 %916  ;;  %v929_v17 = vmul.f32 %v1640_v36, %v1505_v21 }
 0x328   :  { %v919_v52 = vpop.permute.xlu1 %918  ;;  %v922_v4 = vadd.f32 %v917_v59, %v866_v25  ;;  %976 = vrot.lane.b32.xlu0 %v942_v14, %s1187_s27 }
 0x329   :  { %v923_v32 = vadd.f32 %v919_v52, %v867_v29  ;;  %978 = vrot.lane.b32.xlu1 %v943_v48, %s1187_s27 }
 0x32a   :  { %v948_v33 = vadd.f32 %v946_v62, %v922_v4 }
 0x32b   :  { %v949_v11 = vadd.f32 %v947_v1, %v923_v32  ;;  %v269_v60 = vpop.permute.xlu0 %268 }
 0x32c   :  { %v271_v23 = vpop.permute.xlu1 %270  ;;  %986 = vrot.lane.b32.xlu0 %v948_v33, %s1189_s4  ;;  %v274_v53 = vadd.f32 %v269_v60, %v236_v50 }
 0x32d   :  { %988 = vrot.lane.b32.xlu1 %v949_v11, %s1189_s4  ;;  %v275_v2 = vadd.f32 %v271_v23, %v237_v34  ;;  %s1193_s4 = smov [#allocation9]  }
 0x32e   :  { %s1029_s10 = sshll.u32 %s1193_s4, 4  ;;  %s1030_s10 = int_to_ptr.vmem [resolvable:$true] %s1029_s10 }
 0x32f   :  { %v285_v24 = vpop.permute.xlu0 %284  ;;  %s1153_s11 = scalar_lea.vmem %s1030_s10, 256  ;;  %p1158_p6 = scmp.lt.s32.totalorder %s1030_s10, %s1030_s10 }
 0x330   :  { %v287_v30 = vpop.permute.xlu1 %286  ;;  %254 = vrot.lane.b32.xlu0 %v250_v41, %s1186_s23  ;;  %v290_v26 = vadd.f32 %v285_v24, %v240_v27  ;;  %p1154_p5 = scmp.ne.s32.totalorder %s1030_s10, %s1153_s11  ;;  %p1159_p7 = scmp.lt.s32.totalorder %s1153_s11, %s1153_s11 }
 0x331   :  { %256 = vrot.lane.b32.xlu1 %v251_v22, %s1186_s23  ;;  %v291_v37 = vadd.f32 %v287_v30, %v241_v63 }
 0x332   :  { %p1160_p8 = por %p1159_p7, %p1158_p6 }
 0x333   :  { %v701_v31 = vpop.permute.xlu0 %700 }
 0x334   :  { %v703_v16 = vpop.permute.xlu1 %702  ;;  %312 = vrot.lane.b32.xlu0 %v308_v15, %s1187_s27  ;;  %v706_v10 = vadd.f32 %v701_v31, %v680_v7  ;;  %p1161_p9 = pnand %p1160_p8, %p1154_p5 }
 0x335   :  { %314 = vrot.lane.b32.xlu1 %v309_v47, %s1187_s27  ;;  %v707_v42 = vadd.f32 %v703_v16, %v681_v9 }
 0x337   :  { %v759_v56 = vpop.permute.xlu0 %758 }
 0x338   :  { %v761_v19 = vpop.permute.xlu1 %760  ;;  %322 = vrot.lane.b32.xlu0 %v274_v53, %s1186_s23  ;;  %v764_v46 = vadd.f32 %v759_v56, %v706_v10 }
 0x339   :  { %324 = vrot.lane.b32.xlu1 %v275_v2, %s1186_s23  ;;  %v765_v3 = vadd.f32 %v761_v19, %v707_v42  ;;  %v247_v19 = vmul.f32 %v1539_v61, %v1467_v8 }
 0x33b   :  { %v817_v45 = vpop.permute.xlu0 %816 }
 0x33c   :  { %v819_v40 = vpop.permute.xlu1 %818  ;;  %298 = vrot.lane.b32.xlu0 %v294_v12, %s1186_s23  ;;  %v822_v43 = vadd.f32 %v817_v45, %v764_v46 }
 0x33d   :  { %300 = vrot.lane.b32.xlu1 %v295_v54, %s1186_s23  ;;  %v823_v6 = vadd.f32 %v819_v40, %v765_v3 }
 0x33f   :  { %v875_v51 = vpop.permute.xlu0 %874 }
 0x340   :  { %v877_v5 = vpop.permute.xlu1 %876  ;;  %v880_v39 = vadd.f32 %v875_v51, %v822_v43  ;;  %332 = vrot.lane.b32.xlu0 %v290_v26, %s1187_s27 }
 0x341   :  { %v881_v58 = vadd.f32 %v877_v5, %v823_v6  ;;  %334 = vrot.lane.b32.xlu1 %v291_v37, %s1187_s27  ;;  %s228_s27 = sld [smem:[#allocation4]] }
 0x342   :  { %v930_v0 = vadd.f32 %v928_v57, %v880_v39 }
 0x343   :  { %v931_v25 = vadd.f32 %v929_v17, %v881_v58  ;;  %v957_v14 = vpop.permute.xlu0 %956 }
 0x344   :  { %v959_v29 = vpop.permute.xlu1 %958  ;;  %v962_v52 = vadd.f32 %v957_v14, %v930_v0 }
 0x345   :  { %v963_v62 = vadd.f32 %v959_v29, %v931_v25 }
 0x347   :  { %v231_v44 = vstv %s228_s27 }
 0x348   :  { %v232_v15 = vmul.f32 %v231_v44, %v1531_v35  ;;  %v233_v47 = vmul.f32 %v231_v44, %v1535_v13 }
 0x392   :  { %v967_v48 = vpop.permute.xlu0 %966 }
 0x393   :  { %v969_v59 = vpop.permute.xlu1 %968  ;;  %v972_v1 = vadd.f32 %v967_v48, %v962_v52 }
 0x394   :  { %v973_v33 = vadd.f32 %v969_v59, %v963_v62 }
 0x39a   :  { %v977_v4 = vpop.permute.xlu0 %976 }
 0x39b   :  { %v979_v32 = vpop.permute.xlu1 %978  ;;  %v982_v11 = vadd.f32 %v977_v4, %v972_v1 }
 0x39c   :  { %v983_v49 = vadd.f32 %v979_v32, %v973_v33 }
 0x39e   :  { %v987_v60 = vpop.permute.xlu0 %986 }
 0x39f   :  { %v989_v38 = vpop.permute.xlu1 %988  ;;  %v992_v23 = vadd.f32 %v987_v60, %v982_v11 }
 0x3a0   :  { %v993_v41 = vadd.f32 %v989_v38, %v983_v49 }
 0x3a1   :  { %996 = vrot.lane.b32.xlu0 %v992_v23, %s1188_s29 }
 0x3a2   :  { %998 = vrot.lane.b32.xlu1 %v993_v41, %s1188_s29  ;;  %v255_v21 = vpop.permute.xlu0 %254  ;;  %s1192_s29 = smov 123  }
 0x3a3   :  { %v257_v36 = vpop.permute.xlu1 %256  ;;  %v260_v28 = vadd.f32 %v255_v21, %v232_v15 }
 0x3a4   :  { %v261_v50 = vadd.f32 %v257_v36, %v233_v47 }
 0x3a6   :  { %v313_v24 = vpop.permute.xlu0 %312 }
 0x3a7   :  { %v315_v22 = vpop.permute.xlu1 %314  ;;  %v318_v34 = vadd.f32 %v313_v24, %v260_v28 }
 0x3a8   :  { %v319_v2 = vadd.f32 %v315_v22, %v261_v50 }
 0x3aa   :  { %v323_v30 = vpop.permute.xlu0 %322 }
 0x3ab   :  { %v325_v31 = vpop.permute.xlu1 %324  ;;  %v328_v56 = vadd.f32 %v323_v30, %v318_v34 }
 0x3ac   :  { %v329_v7 = vadd.f32 %v325_v31, %v319_v2 }
 0x3ae   :  { %v299_v16 = vpop.permute.xlu0 %298 }
 0x3af   :  { %v301_v53 = vpop.permute.xlu1 %300  ;;  %v304_v10 = vadd.f32 %v299_v16, %v246_v20 }
 0x3b0   :  { %v305_v42 = vadd.f32 %v301_v53, %v247_v19 }
 0x3b2   :  { %v333_v9 = vpop.permute.xlu0 %332 }
 0x3b3   :  { %v335_v35 = vpop.permute.xlu1 %334  ;;  %v338_v12 = vadd.f32 %v333_v9, %v328_v56 }
 0x3b4   :  { %v339_v13 = vadd.f32 %v335_v35, %v329_v7 }
 0x3b5   :  { %v340_v45 = vadd.f32 %v338_v12, %v304_v10 }
 0x3b6   :  { %v341_v54 = vadd.f32 %v339_v13, %v305_v42 }
 0x413   :  { %v997_v18 = vpop.permute.xlu0 %996 }
 0x414   :  { %v999_v27 = vpop.permute.xlu1 %998  ;;  %v1002_v46 = vadd.f32 %v997_v18, %v340_v45 }
 0x415   :  { %v1003_v40 = vadd.f32 %v999_v27, %v341_v54 }
 0x416   :  { %1006 = vrot.lane.b32.xlu0 %v1002_v46, %s1186_s23 }
 0x417   :  { %1008 = vrot.lane.b32.xlu1 %v1003_v40, %s1186_s23 }
 0x41a   :  { %1015 = vrot.lane.b32.xlu0 %v1002_v46, %s1192_s29 }
 0x41b   :  { %1017 = vrot.lane.b32.xlu1 %v1003_v40, %s1192_s29 }
 0x488   :  { %v1007_v8 = vpop.permute.xlu0 %1006 }
 0x489   :  { %v1009_v55 = vpop.permute.xlu1 %1008  ;;  %1013 = vst.msk [vmem:[#allocation9] sm:$0xff] %vm1012_vm9, %v1007_v8 }
 0x48a   :  { %1014 = vst.msk [vmem:[#allocation9 + $0x8] sm:$0xff] %vm1012_vm9, %v1009_v55 }
 0x48c   :  { %v1016_v61 = vpop.permute.xlu0 %1015 }
 0x48d   :  { %v1018_v63 = vpop.permute.xlu1 %1017  ;;  %1022 = vst.msk [vmem:[#allocation9] sm:$0xff] %vm1021_vm10, %v1016_v61 }
 0x48e   :  { %1023 = vst.msk [vmem:[#allocation9 + $0x8] sm:$0xff] %vm1021_vm10, %v1018_v63 }
 0x48f   :  { %1164 = shalt.err (!%p1161_p9)
}
 0x490   :  { %1035 = dma.vmem_to_hbm [thread:$0]  %s1030_s10, 256, %s1729_s2, [#allocation6], %s1181_s15, %s1181_s15, %s1182_s16  }
 0x491   :  { %1177 = dma.done.wait [#allocation6], 256  }
 0x492   :  { %1178 = vsyncadd [#allocation6], 4294967040 }
 0x493   :  { %1039 = vsyncpa [#allocation5], 1 }
 0x494   :  { %1040 = vsyncpa [#allocation6], 1 }
 0x495   :  { %1041 = vsyncpa [#allocation7], 1 }

</bundles_post_ra>
